<compile_context>
chip_gen: v6e
topology: v6e:2x2x1
jax: 0.10.0
libtpu: 0.0.40
codegen_flags: <defaults>
</compile_context>

<pallas_src>
import functools
import math

import jax
import jax.numpy as jnp
from jax.experimental import pallas as pl
from jax.experimental.pallas import tpu as pltpu


def _layernorm(x, gamma, beta, eps=1e-12):
    # x: [T, D], gamma/beta: [1, D]; normalize over the last dim (d_model)
    mean = jnp.mean(x, axis=-1, keepdims=True)
    var = jnp.mean((x - mean) ** 2, axis=-1, keepdims=True)
    return (x - mean) * jax.lax.rsqrt(var + eps) * gamma + beta


def encoder_layer_kernel(
    # per-grid-step blocks
    xq_ref, xf_ref, bias_ref,
    # parameters (constant blocks)
    wq_ref, bq_ref, wk_ref, bk_ref, wv_ref, bv_ref,
    wo_ref, bo_ref,
    g1_ref, be1_ref,
    w1_ref, b1_ref, w2_ref, b2_ref,
    g2_ref, be2_ref,
    # output
    out_ref,
    # scratch: cached per-head K / V for the current batch row
    k_scr, v_scr,
    *, n_head,
):
    f32 = jnp.float32
    bf16 = jnp.bfloat16

    qi = pl.program_id(1)

    xq = xq_ref[0]                       # [tq, D] f32: query rows + residual
    bias = bias_ref[0].astype(f32)       # [tq, S]: additive mask bias
    tq, D = xq.shape
    dh = D // n_head
    S = k_scr.shape[1]

    # ---- cache per-head K / V once per batch row (hoisted out of qi) -------
    @pl.when(qi == 0)
    def _():
        xf = xf_ref[0]                   # [S, D] bf16: key/value source rows

        def proj(h, carry):
            kh = jnp.dot(xf, wk_ref[h], preferred_element_type=f32) + bk_ref[h]
            vh = jnp.dot(xf, wv_ref[h], preferred_element_type=f32) + bv_ref[h]
            k_scr[h] = kh.astype(bf16)   # [S, dh]
            v_scr[h] = vh.astype(bf16)   # [S, dh]
            return carry

        jax.lax.fori_loop(0, n_head, proj, 0)

    # ---- multi-head self-attention for this query-row tile -----------------
    xq_bf = xq.astype(bf16)
    # fold b_o into the accumulator init (hoisted broadcast)
    acc0 = jnp.broadcast_to(bo_ref[...], (tq, D)).astype(f32)

    def head(h, acc):
        # per-head Q projection (1/sqrt(dh) already folded into wq/bq)
        qh = (jnp.dot(xq_bf, wq_ref[h], preferred_element_type=f32)
              + bq_ref[h]).astype(bf16)                           # [tq, dh]
        kh = k_scr[h]                                             # [S, dh] bf16
        vh = v_scr[h]                                             # [S, dh] bf16
        s = jax.lax.dot_general(qh, kh, (((1,), (1,)), ((), ())),
                                preferred_element_type=f32)       # [tq, S]
        s = s + bias
        s = s - jnp.max(s, axis=-1, keepdims=True)
        p = jnp.exp(s)
        p = p * pl.reciprocal(jnp.sum(p, axis=-1, keepdims=True), approx=True)
        ctx = jnp.dot(p.astype(bf16), vh, preferred_element_type=f32)  # [tq,dh]
        # accumulate straight through the per-head slice of W_o (no concat)
        return acc + jnp.dot(ctx.astype(bf16), wo_ref[h],
                             preferred_element_type=f32)          # [tq, D]

    acc = jax.lax.fori_loop(0, n_head, head, acc0)

    # drop_1 is identity in eval mode
    h1 = _layernorm(xq + acc, g1_ref[...], be1_ref[...])          # [tq, D]

    # Row-tiled position-wise FFN (intermediate bounded to [tq, F]).
    ff = jnp.dot(h1.astype(bf16), w1_ref[...],
                 preferred_element_type=f32) + b1_ref[...]        # [tq, F]
    ff = jnp.maximum(ff, 0.0)                                     # ReLU
    ff = jnp.dot(ff.astype(bf16), w2_ref[...],
                 preferred_element_type=f32) + b2_ref[...]        # [tq, D]

    # drop_2 is identity in eval mode
    out_ref[0] = _layernorm(h1 + ff, g2_ref[...], be2_ref[...]).astype(out_ref.dtype)


def encoder_layer(x, mask, params, *, n_head, q_tile=None):
    B, S, D = x.shape
    F = params["w1"].shape[1]
    assert D % n_head == 0
    dh = D // n_head

    # Query-row tile: whole sequence when short; otherwise prefer an
    # MXU-friendly multiple of 128 that divides S.
    if q_tile is None:
        if S <= 256:
            q_tile = S
        else:
            q_tile = 0
            for cand in (512, 384, 256, 128):
                if S % cand == 0:
                    q_tile = cand
                    break
            if q_tile == 0:
                q_tile = S
                for cand in range(256, 7, -8):
                    if S % cand == 0:
                        q_tile = cand
                        break
    assert S % q_tile == 0, "q_tile must divide S"
    NQ = S // q_tile

    bf16 = jnp.bfloat16
    f32 = jnp.float32
    scale = 1.0 / math.sqrt(dh)

    # Parameter packing / pre-casting (in a real model do this once at load):
    #  * per-head projection weights [H, D, dh] (Q scale folded in),
    #  * W_o split per head [H, dh, D],
    #  * matmul weights in bf16 (f32 accumulation inside the kernel).
    x_f32 = x.astype(f32)
    x_bf16 = x.astype(bf16)                                        # K/V source
    bias = ((mask.astype(f32) - 1.0) * 1e9).astype(bf16)           # additive

    def per_head_w(w, s=1.0):   # [D, D] -> [H, D, dh]
        return (w * s).reshape(D, n_head, dh).transpose(1, 0, 2).astype(bf16)

    def per_head_b(b, s=1.0):   # [1, D] -> [H, 1, dh]
        return (b * s).reshape(1, n_head, dh).transpose(1, 0, 2).astype(f32)

    wq = per_head_w(params["wq"], scale)
    bq = per_head_b(params["bq"], scale)
    wk = per_head_w(params["wk"])
    bk = per_head_b(params["bk"])
    wv = per_head_w(params["wv"])
    bv = per_head_b(params["bv"])
    wo = params["wo"].reshape(n_head, dh, D).astype(bf16)
    w1 = params["w1"].astype(bf16)
    w2 = params["w2"].astype(bf16)

    # VMEM budget: ~75% of physical per-core VMEM, capped at 96 MiB
    # (=> ~48 MiB on v7x's 64 MiB, 96 MiB on v5e/v6e's 128 MiB).
    try:
        phys_vmem = int(pltpu.get_tpu_info().vmem_capacity_bytes)
    except Exception:
        phys_vmem = 64 * 1024 * 1024
    vmem_limit = min(int(phys_vmem * 0.75), 96 * 1024 * 1024)

    flops = (
        B * 2 * S * D * (2 * D)                    # K/V projection, once per b
        + B * NQ * (
            2 * q_tile * D * D                     # Q projection
            + n_head * 4 * q_tile * S * dh         # QK^T + PV
            + 2 * q_tile * D * D                   # output projection
            + 4 * q_tile * D * F))                 # FFN
    cost = pl.CostEstimate(
        flops=flops,
        transcendentals=B * NQ * n_head * q_tile * S,
        bytes_accessed=(4 * B * S * D              # xq stream (f32)
                        + 2 * B * S * D            # xf stream (bf16, once/b)
                        + 2 * B * S * S            # mask bias (bf16)
                        + 4 * B * S * D            # output
                        + 2 * (4 * D * D + 2 * D * F)),   # bf16 weights
    )

    kernel = functools.partial(encoder_layer_kernel, n_head=n_head)

    def _call(single_buffer_weights):
        def const_spec(shape):
            # whole-array parameter block, identical for every grid step
            kwargs = {}
            if single_buffer_weights:
                # constant index_map -> double buffering only wastes VMEM
                kwargs["pipeline_mode"] = pl.Buffered(1)
            return pl.BlockSpec(shape, lambda b, qi: tuple(0 for _ in shape),
                                **kwargs)

        in_specs = [
            pl.BlockSpec((1, q_tile, D), lambda b, qi: (b, qi, 0)),  # xq (f32)
            pl.BlockSpec((1, S, D), lambda b, qi: (b, 0, 0)),        # xf (bf16)
            pl.BlockSpec((1, q_tile, S), lambda b, qi: (b, qi, 0)),  # mask bias
            const_spec((n_head, D, dh)), const_spec((n_head, 1, dh)),   # wq, bq
            const_spec((n_head, D, dh)), const_spec((n_head, 1, dh)),   # wk, bk
            const_spec((n_head, D, dh)), const_spec((n_head, 1, dh)),   # wv, bv
            const_spec((n_head, dh, D)), const_spec((1, D)),            # wo, bo
            const_spec((1, D)), const_spec((1, D)),                     # ln1
            const_spec((D, F)), const_spec((1, F)),                     # w1, b1
            const_spec((F, D)), const_spec((1, D)),                     # w2, b2
            const_spec((1, D)), const_spec((1, D)),                     # ln2
        ]

        return pl.pallas_call(
            kernel,
            out_shape=jax.ShapeDtypeStruct((B, S, D), x_f32.dtype),
            grid_spec=pltpu.PrefetchScalarGridSpec(
                num_scalar_prefetch=0,
                grid=(B, NQ),
                in_specs=in_specs,
                out_specs=pl.BlockSpec((1, q_tile, D), lambda b, qi: (b, qi, 0)),
                scratch_shapes=[pltpu.VMEM((n_head, S, dh), bf16),   # K cache
                                pltpu.VMEM((n_head, S, dh), bf16)],  # V cache
            ),
            compiler_params=pltpu.CompilerParams(
                # qi must be "arbitrary" (KV cached in scratch at qi == 0);
                # B stays "parallel" to feed both v7x TensorCores.
                dimension_semantics=("parallel", "arbitrary"),
                vmem_limit_bytes=vmem_limit),
            cost_estimate=cost,
        )(
            x_f32, x_bf16, bias,
            wq, bq, wk, bk, wv, bv,
            wo, params["bo"].astype(f32),
            params["g1"].astype(f32), params["be1"].astype(f32),
            w1, params["b1"].astype(f32),
            w2, params["b2"].astype(f32),
            params["g2"].astype(f32), params["be2"].astype(f32),
        )

    try:
        return _call(True)
    except Exception:
        # Fallback for Mosaic builds that reject single-buffered constant blocks.
        return _call(False)


def reference(x, mask, p, n_head):
    # pure-JAX f32 reference for correctness check
    B, S, D = x.shape
    dh = D // n_head

    def ln(v, g, b, eps=1e-12):
        m = jnp.mean(v, -1, keepdims=True)
        var = jnp.mean((v - m) ** 2, -1, keepdims=True)
        return (v - m) / jnp.sqrt(var + eps) * g + b

    q = x @ p["wq"] + p["bq"]
    k = x @ p["wk"] + p["bk"]
    v = x @ p["wv"] + p["bv"]

    def split(t):
        return t.reshape(B, S, n_head, dh).transpose(0, 2, 1, 3)  # [B,H,S,dh]

    qh, kh, vh = split(q), split(k), split(v)
    scores = jnp.einsum("bhqd,bhkd->bhqk", qh, kh) / math.sqrt(dh)
    scores = jnp.where(mask[:, None, :, :] == 0.0, -1e9, scores)
    probs = jax.nn.softmax(scores, axis=-1)
    attn = jnp.einsum("bhqk,bhkd->bhqd", probs, vh)
    attn = attn.transpose(0, 2, 1, 3).reshape(B, S, D)
    attn = attn @ p["wo"] + p["bo"]

    h1 = ln(x + attn, p["g1"], p["be1"])
    ff = jnp.maximum(h1 @ p["w1"] + p["b1"], 0.0) @ p["w2"] + p["b2"]
    return ln(h1 + ff, p["g2"], p["be2"])


if __name__ == "__main__":
    # S=32 with q_tile=16 exercises NQ=2 (KV-cache reuse across query tiles)
    B, S, D, F, H = 2, 32, 32, 64, 4

    key = jax.random.PRNGKey(0)
    keys = jax.random.split(key, 16)

    def init(k, shape, scale=0.05):
        return jax.random.normal(k, shape, jnp.float32) * scale

    params = {
        "wq": init(keys[0], (D, D)), "bq": init(keys[1], (1, D)),
        "wk": init(keys[2], (D, D)), "bk": init(keys[3], (1, D)),
        "wv": init(keys[4], (D, D)), "bv": init(keys[5], (1, D)),
        "wo": init(keys[6], (D, D)), "bo": init(keys[7], (1, D)),
        "g1": jnp.ones((1, D), jnp.float32), "be1": jnp.zeros((1, D), jnp.float32),
        "w1": init(keys[8], (D, F)), "b1": init(keys[9], (1, F)),
        "w2": init(keys[10], (F, D)), "b2": init(keys[11], (1, D)),
        "g2": jnp.ones((1, D), jnp.float32), "be2": jnp.zeros((1, D), jnp.float32),
    }

    x = jax.random.normal(keys[12], (B, S, D), jnp.float32)
    # causal-ish mask: 1 = keep, 0 = masked (every row keeps >= 1 position)
    mask = jnp.tril(jnp.ones((S, S), jnp.float32))[None].repeat(B, axis=0)

    out = encoder_layer(x, mask, params, n_head=H, q_tile=16)
    out = jax.block_until_ready(out)

    ref = reference(x, mask, params, H)
    assert out.shape == (B, S, D)
    # bf16 MXU inputs + approx reciprocal -> relaxed tolerance vs f32 reference
    assert jnp.allclose(out, ref, atol=2e-2, rtol=2e-2), "mismatch vs reference"

    print("KERNEL_OK")
</pallas_src>

<mosaic_0001>
module attributes {stable_mosaic.version = 11 : i64} {
  func.func @encoder_layer_kernel(%arg0: i32, %arg1: i32, %arg2: memref<1x16x32xf32, #tpu.memory_space<vmem>>, %arg3: memref<1x32x32xbf16, #tpu.memory_space<vmem>>, %arg4: memref<1x16x32xbf16, #tpu.memory_space<vmem>>, %arg5: memref<4x32x8xbf16, #tpu.memory_space<vmem>>, %arg6: memref<4x1x8xf32, #tpu.memory_space<vmem>>, %arg7: memref<4x32x8xbf16, #tpu.memory_space<vmem>>, %arg8: memref<4x1x8xf32, #tpu.memory_space<vmem>>, %arg9: memref<4x32x8xbf16, #tpu.memory_space<vmem>>, %arg10: memref<4x1x8xf32, #tpu.memory_space<vmem>>, %arg11: memref<4x8x32xbf16, #tpu.memory_space<vmem>>, %arg12: memref<1x32xf32, #tpu.memory_space<vmem>>, %arg13: memref<1x32xf32, #tpu.memory_space<vmem>>, %arg14: memref<1x32xf32, #tpu.memory_space<vmem>>, %arg15: memref<32x64xbf16, #tpu.memory_space<vmem>>, %arg16: memref<1x64xf32, #tpu.memory_space<vmem>>, %arg17: memref<64x32xbf16, #tpu.memory_space<vmem>>, %arg18: memref<1x32xf32, #tpu.memory_space<vmem>>, %arg19: memref<1x32xf32, #tpu.memory_space<vmem>>, %arg20: memref<1x32xf32, #tpu.memory_space<vmem>>, %arg21: memref<1x16x32xf32, #tpu.memory_space<vmem>>, %arg22: memref<4x32x8xbf16, #tpu.memory_space<vmem>>, %arg23: memref<4x32x8xbf16, #tpu.memory_space<vmem>>) attributes {dimension_semantics = [#tpu.dimension_semantics<parallel>, #tpu.dimension_semantics<arbitrary>], iteration_bounds = array<i64: 2, 2>, scalar_prefetch = 0 : i64, scratch_operands = 2 : i64, tpu.core_type = #tpu.core_type<tc>, window_params = [{transform_indices = @transform_0, window_bounds = array<i64: 1, 16, 32>}, {transform_indices = @transform_1, window_bounds = array<i64: 1, 32, 32>}, {transform_indices = @transform_2, window_bounds = array<i64: 1, 16, 32>}, {pipeline_mode = #tpu.pipeline_mode<synchronous>, transform_indices = @transform_3, window_bounds = array<i64: 4, 32, 8>}, {pipeline_mode = #tpu.pipeline_mode<synchronous>, transform_indices = @transform_4, window_bounds = array<i64: 4, 1, 8>}, {pipeline_mode = #tpu.pipeline_mode<synchronous>, transform_indices = @transform_5, window_bounds = array<i64: 4, 32, 8>}, {pipeline_mode = #tpu.pipeline_mode<synchronous>, transform_indices = @transform_6, window_bounds = array<i64: 4, 1, 8>}, {pipeline_mode = #tpu.pipeline_mode<synchronous>, transform_indices = @transform_7, window_bounds = array<i64: 4, 32, 8>}, {pipeline_mode = #tpu.pipeline_mode<synchronous>, transform_indices = @transform_8, window_bounds = array<i64: 4, 1, 8>}, {pipeline_mode = #tpu.pipeline_mode<synchronous>, transform_indices = @transform_9, window_bounds = array<i64: 4, 8, 32>}, {pipeline_mode = #tpu.pipeline_mode<synchronous>, transform_indices = @transform_10, window_bounds = array<i64: 1, 32>}, {pipeline_mode = #tpu.pipeline_mode<synchronous>, transform_indices = @transform_11, window_bounds = array<i64: 1, 32>}, {pipeline_mode = #tpu.pipeline_mode<synchronous>, transform_indices = @transform_12, window_bounds = array<i64: 1, 32>}, {pipeline_mode = #tpu.pipeline_mode<synchronous>, transform_indices = @transform_13, window_bounds = array<i64: 32, 64>}, {pipeline_mode = #tpu.pipeline_mode<synchronous>, transform_indices = @transform_14, window_bounds = array<i64: 1, 64>}, {pipeline_mode = #tpu.pipeline_mode<synchronous>, transform_indices = @transform_15, window_bounds = array<i64: 64, 32>}, {pipeline_mode = #tpu.pipeline_mode<synchronous>, transform_indices = @transform_16, window_bounds = array<i64: 1, 32>}, {pipeline_mode = #tpu.pipeline_mode<synchronous>, transform_indices = @transform_17, window_bounds = array<i64: 1, 32>}, {pipeline_mode = #tpu.pipeline_mode<synchronous>, transform_indices = @transform_18, window_bounds = array<i64: 1, 32>}, {transform_indices = @transform_19, window_bounds = array<i64: 1, 16, 32>}]} {
    %c0 = arith.constant 0 : index
    %c0_0 = arith.constant 0 : index
    %c0_1 = arith.constant 0 : index
    %0 = vector.load %arg2[%c0, %c0_0, %c0_1] : memref<1x16x32xf32, #tpu.memory_space<vmem>>, vector<1x16x32xf32>
    %1 = vector.shape_cast %0 : vector<1x16x32xf32> to vector<16x32xf32>
    %c0_2 = arith.constant 0 : index
    %c0_3 = arith.constant 0 : index
    %c0_4 = arith.constant 0 : index
    %2 = vector.load %arg4[%c0_2, %c0_3, %c0_4] : memref<1x16x32xbf16, #tpu.memory_space<vmem>>, vector<1x16x32xbf16>
    %3 = vector.shape_cast %2 : vector<1x16x32xbf16> to vector<16x32xbf16>
    %4 = arith.extf %3 : vector<16x32xbf16> to vector<16x32xf32>
    %c0_i32 = arith.constant 0 : i32
    %5 = arith.cmpi eq, %arg1, %c0_i32 : i32
    %6 = arith.extui %5 : i1 to i32
    %c0_i32_5 = arith.constant 0 : i32
    %7 = arith.cmpi ne, %6, %c0_i32_5 : i32
    scf.if %7 {
      %c0_41 = arith.constant 0 : index
      %c0_42 = arith.constant 0 : index
      %c0_43 = arith.constant 0 : index
      %81 = vector.load %arg3[%c0_41, %c0_42, %c0_43] : memref<1x32x32xbf16, #tpu.memory_space<vmem>>, vector<1x32x32xbf16>
      %82 = vector.shape_cast %81 : vector<1x32x32xbf16> to vector<32x32xbf16>
      %c0_i32_44 = arith.constant 0 : i32
      %c4_i32_45 = arith.constant 4 : i32
      %83 = arith.addi %c0_i32_44, %c4_i32_45 : i32
      %c1_i32_46 = arith.constant 1 : i32
      scf.for %arg24 = %c0_i32_44 to %83 step %c1_i32_46  : i32 {
        %84 = arith.index_cast %arg24 : i32 to index
        %c0_48 = arith.constant 0 : index
        %c0_49 = arith.constant 0 : index
        %85 = vector.load %arg7[%84, %c0_48, %c0_49] : memref<4x32x8xbf16, #tpu.memory_space<vmem>>, vector<1x32x8xbf16>
        %86 = vector.shape_cast %85 : vector<1x32x8xbf16> to vector<32x8xbf16>
        %cst_50 = arith.constant dense<0.000000e+00> : vector<32x8xf32>
        %87 = tpu.matmul %82, %86, %cst_50 {dimension_numbers = #tpu.dot_dimension_numbers<[1], [0], [0], [1], [0, 0, 1, 1], [], []>} : vector<32x32xbf16>, vector<32x8xbf16>, vector<32x8xf32> -> vector<32x8xf32>
        %88 = arith.index_cast %arg24 : i32 to index
        %c0_51 = arith.constant 0 : index
        %c0_52 = arith.constant 0 : index
        %89 = vector.load %arg8[%88, %c0_51, %c0_52] : memref<4x1x8xf32, #tpu.memory_space<vmem>>, vector<1x1x8xf32>
        %90 = vector.shape_cast %89 : vector<1x1x8xf32> to vector<1x8xf32>
        %91 = vector.broadcast %90 : vector<1x8xf32> to vector<32x8xf32>
        %92 = arith.addf %87, %91 : vector<32x8xf32>
        %93 = arith.index_cast %arg24 : i32 to index
        %c0_53 = arith.constant 0 : index
        %c0_54 = arith.constant 0 : index
        %94 = vector.load %arg9[%93, %c0_53, %c0_54] : memref<4x32x8xbf16, #tpu.memory_space<vmem>>, vector<1x32x8xbf16>
        %95 = vector.shape_cast %94 : vector<1x32x8xbf16> to vector<32x8xbf16>
        %cst_55 = arith.constant dense<0.000000e+00> : vector<32x8xf32>
        %96 = tpu.matmul %82, %95, %cst_55 {dimension_numbers = #tpu.dot_dimension_numbers<[1], [0], [0], [1], [0, 0, 1, 1], [], []>} : vector<32x32xbf16>, vector<32x8xbf16>, vector<32x8xf32> -> vector<32x8xf32>
        %97 = arith.index_cast %arg24 : i32 to index
        %c0_56 = arith.constant 0 : index
        %c0_57 = arith.constant 0 : index
        %98 = vector.load %arg10[%97, %c0_56, %c0_57] : memref<4x1x8xf32, #tpu.memory_space<vmem>>, vector<1x1x8xf32>
        %99 = vector.shape_cast %98 : vector<1x1x8xf32> to vector<1x8xf32>
        %100 = vector.broadcast %99 : vector<1x8xf32> to vector<32x8xf32>
        %101 = arith.addf %96, %100 : vector<32x8xf32>
        %102 = arith.truncf %92 : vector<32x8xf32> to vector<32x8xbf16>
        %103 = arith.index_cast %arg24 : i32 to index
        %c0_58 = arith.constant 0 : index
        %c0_59 = arith.constant 0 : index
        %104 = vector.load %arg22[%103, %c0_58, %c0_59] : memref<4x32x8xbf16, #tpu.memory_space<vmem>>, vector<1x32x8xbf16>
        %105 = vector.shape_cast %104 : vector<1x32x8xbf16> to vector<32x8xbf16>
        %106 = vector.shape_cast %102 : vector<32x8xbf16> to vector<1x32x8xbf16>
        tpu.vector_store %arg22[%103, %c0_58, %c0_59], %106 {strides = array<i32>} : memref<4x32x8xbf16, #tpu.memory_space<vmem>>, vector<1x32x8xbf16>,
        %107 = arith.truncf %101 : vector<32x8xf32> to vector<32x8xbf16>
        %108 = arith.index_cast %arg24 : i32 to index
        %c0_60 = arith.constant 0 : index
        %c0_61 = arith.constant 0 : index
        %109 = vector.load %arg23[%108, %c0_60, %c0_61] : memref<4x32x8xbf16, #tpu.memory_space<vmem>>, vector<1x32x8xbf16>
        %110 = vector.shape_cast %109 : vector<1x32x8xbf16> to vector<32x8xbf16>
        %111 = vector.shape_cast %107 : vector<32x8xbf16> to vector<1x32x8xbf16>
        tpu.vector_store %arg23[%108, %c0_60, %c0_61], %111 {strides = array<i32>} : memref<4x32x8xbf16, #tpu.memory_space<vmem>>, vector<1x32x8xbf16>,
      }
      %c4_i32_47 = arith.constant 4 : i32
    } else {
    }
    %8 = arith.truncf %1 : vector<16x32xf32> to vector<16x32xbf16>
    %c0_6 = arith.constant 0 : index
    %c0_7 = arith.constant 0 : index
    %9 = vector.load %arg12[%c0_6, %c0_7] : memref<1x32xf32, #tpu.memory_space<vmem>>, vector<1x32xf32>
    %10 = vector.shape_cast %9 : vector<1x32xf32> to vector<1x32xf32>
    %11 = vector.broadcast %10 : vector<1x32xf32> to vector<16x32xf32>
    %c0_i32_8 = arith.constant 0 : i32
    %c4_i32 = arith.constant 4 : i32
    %12 = arith.addi %c0_i32_8, %c4_i32 : i32
    %c1_i32 = arith.constant 1 : i32
    %13 = scf.for %arg24 = %c0_i32_8 to %12 step %c1_i32 iter_args(%arg25 = %11) -> (vector<16x32xf32>)  : i32 {
      %81 = arith.index_cast %arg24 : i32 to index
      %c0_41 = arith.constant 0 : index
      %c0_42 = arith.constant 0 : index
      %82 = vector.load %arg5[%81, %c0_41, %c0_42] : memref<4x32x8xbf16, #tpu.memory_space<vmem>>, vector<1x32x8xbf16>
      %83 = vector.shape_cast %82 : vector<1x32x8xbf16> to vector<32x8xbf16>
      %cst_43 = arith.constant dense<0.000000e+00> : vector<16x8xf32>
      %84 = tpu.matmul %8, %83, %cst_43 {dimension_numbers = #tpu.dot_dimension_numbers<[1], [0], [0], [1], [0, 0, 1, 1], [], []>} : vector<16x32xbf16>, vector<32x8xbf16>, vector<16x8xf32> -> vector<16x8xf32>
      %85 = arith.index_cast %arg24 : i32 to index
      %c0_44 = arith.constant 0 : index
      %c0_45 = arith.constant 0 : index
      %86 = vector.load %arg6[%85, %c0_44, %c0_45] : memref<4x1x8xf32, #tpu.memory_space<vmem>>, vector<1x1x8xf32>
      %87 = vector.shape_cast %86 : vector<1x1x8xf32> to vector<1x8xf32>
      %88 = vector.broadcast %87 : vector<1x8xf32> to vector<16x8xf32>
      %89 = arith.addf %84, %88 : vector<16x8xf32>
      %90 = arith.truncf %89 : vector<16x8xf32> to vector<16x8xbf16>
      %91 = arith.index_cast %arg24 : i32 to index
      %c0_46 = arith.constant 0 : index
      %c0_47 = arith.constant 0 : index
      %92 = vector.load %arg22[%91, %c0_46, %c0_47] : memref<4x32x8xbf16, #tpu.memory_space<vmem>>, vector<1x32x8xbf16>
      %93 = vector.shape_cast %92 : vector<1x32x8xbf16> to vector<32x8xbf16>
      %94 = arith.index_cast %arg24 : i32 to index
      %c0_48 = arith.constant 0 : index
      %c0_49 = arith.constant 0 : index
      %95 = vector.load %arg23[%94, %c0_48, %c0_49] : memref<4x32x8xbf16, #tpu.memory_space<vmem>>, vector<1x32x8xbf16>
      %96 = vector.shape_cast %95 : vector<1x32x8xbf16> to vector<32x8xbf16>
      %cst_50 = arith.constant dense<0.000000e+00> : vector<16x32xf32>
      %97 = tpu.matmul %90, %93, %cst_50 {dimension_numbers = #tpu.dot_dimension_numbers<[1], [1], [0], [0], [0, 0, 1, 0], [], []>} : vector<16x8xbf16>, vector<32x8xbf16>, vector<16x32xf32> -> vector<16x32xf32>
      %98 = arith.addf %97, %4 : vector<16x32xf32>
      %cst_51 = arith.constant dense<0xFF800000> : vector<16xf32>
      %99 = vector.multi_reduction <maximumf>, %98, %cst_51 [1] : vector<16x32xf32> to vector<16xf32>
      %100 = vector.shape_cast %99 : vector<16xf32> to vector<16x1xf32>
      %101 = vector.broadcast %100 : vector<16x1xf32> to vector<16x32xf32>
      %102 = arith.subf %98, %101 : vector<16x32xf32>
      %103 = math.exp %102 : vector<16x32xf32>
      %cst_52 = arith.constant dense<0.000000e+00> : vector<16xf32>
      %104 = vector.multi_reduction <add>, %103, %cst_52 [1] : vector<16x32xf32> to vector<16xf32>
      %105 = vector.shape_cast %104 : vector<16xf32> to vector<16x1xf32>
      %106 = tpu.reciprocal %105 {approx = true} : vector<16x1xf32> -> vector<16x1xf32>
      %107 = vector.broadcast %106 : vector<16x1xf32> to vector<16x32xf32>
      %108 = arith.mulf %103, %107 : vector<16x32xf32>
      %109 = arith.truncf %108 : vector<16x32xf32> to vector<16x32xbf16>
      %cst_53 = arith.constant dense<0.000000e+00> : vector<16x8xf32>
      %110 = tpu.matmul %109, %96, %cst_53 {dimension_numbers = #tpu.dot_dimension_numbers<[1], [0], [0], [1], [0, 0, 1, 1], [], []>} : vector<16x32xbf16>, vector<32x8xbf16>, vector<16x8xf32> -> vector<16x8xf32>
      %111 = arith.truncf %110 : vector<16x8xf32> to vector<16x8xbf16>
      %112 = arith.index_cast %arg24 : i32 to index
      %c0_54 = arith.constant 0 : index
      %c0_55 = arith.constant 0 : index
      %113 = vector.load %arg11[%112, %c0_54, %c0_55] : memref<4x8x32xbf16, #tpu.memory_space<vmem>>, vector<1x8x32xbf16>
      %114 = vector.shape_cast %113 : vector<1x8x32xbf16> to vector<8x32xbf16>
      %cst_56 = arith.constant dense<0.000000e+00> : vector<16x32xf32>
      %115 = tpu.matmul %111, %114, %cst_56 {dimension_numbers = #tpu.dot_dimension_numbers<[1], [0], [0], [1], [0, 0, 1, 1], [], []>} : vector<16x8xbf16>, vector<8x32xbf16>, vector<16x32xf32> -> vector<16x32xf32>
      %116 = arith.addf %arg25, %115 : vector<16x32xf32>
      scf.yield %116 : vector<16x32xf32>
    }
    %c4_i32_9 = arith.constant 4 : i32
    %14 = arith.addf %1, %13 : vector<16x32xf32>
    %c0_10 = arith.constant 0 : index
    %c0_11 = arith.constant 0 : index
    %15 = vector.load %arg13[%c0_10, %c0_11] : memref<1x32xf32, #tpu.memory_space<vmem>>, vector<1x32xf32>
    %c0_12 = arith.constant 0 : index
    %c0_13 = arith.constant 0 : index
    %16 = vector.load %arg14[%c0_12, %c0_13] : memref<1x32xf32, #tpu.memory_space<vmem>>, vector<1x32xf32>
    %cst = arith.constant dense<0.000000e+00> : vector<16xf32>
    %17 = vector.multi_reduction <add>, %14, %cst [1] : vector<16x32xf32> to vector<16xf32>
    %18 = vector.shape_cast %17 : vector<16xf32> to vector<16x1xf32>
    %cst_14 = arith.constant 3.200000e+01 : f32
    %19 = vector.broadcast %cst_14 : f32 to vector<16x1xf32>
    %20 = arith.divf %18, %19 : vector<16x1xf32>
    %21 = vector.broadcast %20 : vector<16x1xf32> to vector<16x32xf32>
    %22 = arith.subf %14, %21 : vector<16x32xf32>
    %23 = arith.mulf %22, %22 : vector<16x32xf32>
    %cst_15 = arith.constant dense<0.000000e+00> : vector<16xf32>
    %24 = vector.multi_reduction <add>, %23, %cst_15 [1] : vector<16x32xf32> to vector<16xf32>
    %25 = vector.shape_cast %24 : vector<16xf32> to vector<16x1xf32>
    %cst_16 = arith.constant 3.200000e+01 : f32
    %26 = vector.broadcast %cst_16 : f32 to vector<16x1xf32>
    %27 = arith.divf %25, %26 : vector<16x1xf32>
    %28 = vector.broadcast %20 : vector<16x1xf32> to vector<16x32xf32>
    %29 = arith.subf %14, %28 : vector<16x32xf32>
    %cst_17 = arith.constant 9.99999996E-13 : f32
    %30 = vector.broadcast %cst_17 : f32 to vector<16x1xf32>
    %31 = arith.addf %27, %30 : vector<16x1xf32>
    %32 = math.rsqrt %31 : vector<16x1xf32>
    %33 = vector.broadcast %32 : vector<16x1xf32> to vector<16x32xf32>
    %34 = arith.mulf %29, %33 : vector<16x32xf32>
    %35 = vector.broadcast %15 : vector<1x32xf32> to vector<16x32xf32>
    %36 = arith.mulf %34, %35 : vector<16x32xf32>
    %37 = vector.broadcast %16 : vector<1x32xf32> to vector<16x32xf32>
    %38 = arith.addf %36, %37 : vector<16x32xf32>
    %39 = arith.truncf %38 : vector<16x32xf32> to vector<16x32xbf16>
    %c0_18 = arith.constant 0 : index
    %c0_19 = arith.constant 0 : index
    %40 = vector.load %arg15[%c0_18, %c0_19] : memref<32x64xbf16, #tpu.memory_space<vmem>>, vector<32x64xbf16>
    %cst_20 = arith.constant dense<0.000000e+00> : vector<16x64xf32>
    %41 = tpu.matmul %39, %40, %cst_20 {dimension_numbers = #tpu.dot_dimension_numbers<[1], [0], [0], [1], [0, 0, 1, 1], [], []>} : vector<16x32xbf16>, vector<32x64xbf16>, vector<16x64xf32> -> vector<16x64xf32>
    %c0_21 = arith.constant 0 : index
    %c0_22 = arith.constant 0 : index
    %42 = vector.load %arg16[%c0_21, %c0_22] : memref<1x64xf32, #tpu.memory_space<vmem>>, vector<1x64xf32>
    %43 = vector.broadcast %42 : vector<1x64xf32> to vector<16x64xf32>
    %44 = arith.addf %41, %43 : vector<16x64xf32>
    %cst_23 = arith.constant 0.000000e+00 : f32
    %45 = vector.broadcast %cst_23 : f32 to vector<16x64xf32>
    %46 = arith.maximumf %44, %45 : vector<16x64xf32>
    %47 = arith.truncf %46 : vector<16x64xf32> to vector<16x64xbf16>
    %c0_24 = arith.constant 0 : index
    %c0_25 = arith.constant 0 : index
    %48 = vector.load %arg17[%c0_24, %c0_25] : memref<64x32xbf16, #tpu.memory_space<vmem>>, vector<64x32xbf16>
    %cst_26 = arith.constant dense<0.000000e+00> : vector<16x32xf32>
    %49 = tpu.matmul %47, %48, %cst_26 {dimension_numbers = #tpu.dot_dimension_numbers<[1], [0], [0], [1], [0, 0, 1, 1], [], []>} : vector<16x64xbf16>, vector<64x32xbf16>, vector<16x32xf32> -> vector<16x32xf32>
    %c0_27 = arith.constant 0 : index
    %c0_28 = arith.constant 0 : index
    %50 = vector.load %arg18[%c0_27, %c0_28] : memref<1x32xf32, #tpu.memory_space<vmem>>, vector<1x32xf32>
    %51 = vector.broadcast %50 : vector<1x32xf32> to vector<16x32xf32>
    %52 = arith.addf %49, %51 : vector<16x32xf32>
    %53 = arith.addf %38, %52 : vector<16x32xf32>
    %c0_29 = arith.constant 0 : index
    %c0_30 = arith.constant 0 : index
    %54 = vector.load %arg19[%c0_29, %c0_30] : memref<1x32xf32, #tpu.memory_space<vmem>>, vector<1x32xf32>
    %c0_31 = arith.constant 0 : index
    %c0_32 = arith.constant 0 : index
    %55 = vector.load %arg20[%c0_31, %c0_32] : memref<1x32xf32, #tpu.memory_space<vmem>>, vector<1x32xf32>
    %cst_33 = arith.constant dense<0.000000e+00> : vector<16xf32>
    %56 = vector.multi_reduction <add>, %53, %cst_33 [1] : vector<16x32xf32> to vector<16xf32>
    %57 = vector.shape_cast %56 : vector<16xf32> to vector<16x1xf32>
    %cst_34 = arith.constant 3.200000e+01 : f32
    %58 = vector.broadcast %cst_34 : f32 to vector<16x1xf32>
    %59 = arith.divf %57, %58 : vector<16x1xf32>
    %60 = vector.broadcast %59 : vector<16x1xf32> to vector<16x32xf32>
    %61 = arith.subf %53, %60 : vector<16x32xf32>
    %62 = arith.mulf %61, %61 : vector<16x32xf32>
    %cst_35 = arith.constant dense<0.000000e+00> : vector<16xf32>
    %63 = vector.multi_reduction <add>, %62, %cst_35 [1] : vector<16x32xf32> to vector<16xf32>
    %64 = vector.shape_cast %63 : vector<16xf32> to vector<16x1xf32>
    %cst_36 = arith.constant 3.200000e+01 : f32
    %65 = vector.broadcast %cst_36 : f32 to vector<16x1xf32>
    %66 = arith.divf %64, %65 : vector<16x1xf32>
    %67 = vector.broadcast %59 : vector<16x1xf32> to vector<16x32xf32>
    %68 = arith.subf %53, %67 : vector<16x32xf32>
    %cst_37 = arith.constant 9.99999996E-13 : f32
    %69 = vector.broadcast %cst_37 : f32 to vector<16x1xf32>
    %70 = arith.addf %66, %69 : vector<16x1xf32>
    %71 = math.rsqrt %70 : vector<16x1xf32>
    %72 = vector.broadcast %71 : vector<16x1xf32> to vector<16x32xf32>
    %73 = arith.mulf %68, %72 : vector<16x32xf32>
    %74 = vector.broadcast %54 : vector<1x32xf32> to vector<16x32xf32>
    %75 = arith.mulf %73, %74 : vector<16x32xf32>
    %76 = vector.broadcast %55 : vector<1x32xf32> to vector<16x32xf32>
    %77 = arith.addf %75, %76 : vector<16x32xf32>
    %c0_38 = arith.constant 0 : index
    %c0_39 = arith.constant 0 : index
    %c0_40 = arith.constant 0 : index
    %78 = vector.load %arg21[%c0_38, %c0_39, %c0_40] : memref<1x16x32xf32, #tpu.memory_space<vmem>>, vector<1x16x32xf32>
    %79 = vector.shape_cast %78 : vector<1x16x32xf32> to vector<16x32xf32>
    %80 = vector.shape_cast %77 : vector<16x32xf32> to vector<1x16x32xf32>
    tpu.vector_store %arg21[%c0_38, %c0_39, %c0_40], %80 {strides = array<i32>} : memref<1x16x32xf32, #tpu.memory_space<vmem>>, vector<1x16x32xf32>,
    return
  }
  func.func @transform_0(%arg0: i32, %arg1: i32) -> (i32, i32, i32) {
    %c0_i32 = arith.constant 0 : i32
    %c0_i32_0 = arith.constant 0 : i32
    return %arg0, %arg1, %c0_i32 : i32, i32, i32
  }
  func.func @transform_1(%arg0: i32, %arg1: i32) -> (i32, i32, i32) {
    %c0_i32 = arith.constant 0 : i32
    %c0_i32_0 = arith.constant 0 : i32
    %c0_i32_1 = arith.constant 0 : i32
    return %arg0, %c0_i32, %c0_i32_0 : i32, i32, i32
  }
  func.func @transform_2(%arg0: i32, %arg1: i32) -> (i32, i32, i32) {
    %c0_i32 = arith.constant 0 : i32
    %c0_i32_0 = arith.constant 0 : i32
    return %arg0, %arg1, %c0_i32 : i32, i32, i32
  }
  func.func @transform_3(%arg0: i32, %arg1: i32) -> (i32, i32, i32) {
    %c0_i32 = arith.constant 0 : i32
    %c0_i32_0 = arith.constant 0 : i32
    %c0_i32_1 = arith.constant 0 : i32
    %c0_i32_2 = arith.constant 0 : i32
    return %c0_i32, %c0_i32_0, %c0_i32_1 : i32, i32, i32
  }
  func.func @transform_4(%arg0: i32, %arg1: i32) -> (i32, i32, i32) {
    %c0_i32 = arith.constant 0 : i32
    %c0_i32_0 = arith.constant 0 : i32
    %c0_i32_1 = arith.constant 0 : i32
    %c0_i32_2 = arith.constant 0 : i32
    return %c0_i32, %c0_i32_0, %c0_i32_1 : i32, i32, i32
  }
  func.func @transform_5(%arg0: i32, %arg1: i32) -> (i32, i32, i32) {
    %c0_i32 = arith.constant 0 : i32
    %c0_i32_0 = arith.constant 0 : i32
    %c0_i32_1 = arith.constant 0 : i32
    %c0_i32_2 = arith.constant 0 : i32
    return %c0_i32, %c0_i32_0, %c0_i32_1 : i32, i32, i32
  }
  func.func @transform_6(%arg0: i32, %arg1: i32) -> (i32, i32, i32) {
    %c0_i32 = arith.constant 0 : i32
    %c0_i32_0 = arith.constant 0 : i32
    %c0_i32_1 = arith.constant 0 : i32
    %c0_i32_2 = arith.constant 0 : i32
    return %c0_i32, %c0_i32_0, %c0_i32_1 : i32, i32, i32
  }
  func.func @transform_7(%arg0: i32, %arg1: i32) -> (i32, i32, i32) {
    %c0_i32 = arith.constant 0 : i32
    %c0_i32_0 = arith.constant 0 : i32
    %c0_i32_1 = arith.constant 0 : i32
    %c0_i32_2 = arith.constant 0 : i32
    return %c0_i32, %c0_i32_0, %c0_i32_1 : i32, i32, i32
  }
  func.func @transform_8(%arg0: i32, %arg1: i32) -> (i32, i32, i32) {
    %c0_i32 = arith.constant 0 : i32
    %c0_i32_0 = arith.constant 0 : i32
    %c0_i32_1 = arith.constant 0 : i32
    %c0_i32_2 = arith.constant 0 : i32
    return %c0_i32, %c0_i32_0, %c0_i32_1 : i32, i32, i32
  }
  func.func @transform_9(%arg0: i32, %arg1: i32) -> (i32, i32, i32) {
    %c0_i32 = arith.constant 0 : i32
    %c0_i32_0 = arith.constant 0 : i32
    %c0_i32_1 = arith.constant 0 : i32
    %c0_i32_2 = arith.constant 0 : i32
    return %c0_i32, %c0_i32_0, %c0_i32_1 : i32, i32, i32
  }
  func.func @transform_10(%arg0: i32, %arg1: i32) -> (i32, i32) {
    %c0_i32 = arith.constant 0 : i32
    %c0_i32_0 = arith.constant 0 : i32
    %c0_i32_1 = arith.constant 0 : i32
    return %c0_i32, %c0_i32_0 : i32, i32
  }
  func.func @transform_11(%arg0: i32, %arg1: i32) -> (i32, i32) {
    %c0_i32 = arith.constant 0 : i32
    %c0_i32_0 = arith.constant 0 : i32
    %c0_i32_1 = arith.constant 0 : i32
    return %c0_i32, %c0_i32_0 : i32, i32
  }
  func.func @transform_12(%arg0: i32, %arg1: i32) -> (i32, i32) {
    %c0_i32 = arith.constant 0 : i32
    %c0_i32_0 = arith.constant 0 : i32
    %c0_i32_1 = arith.constant 0 : i32
    return %c0_i32, %c0_i32_0 : i32, i32
  }
  func.func @transform_13(%arg0: i32, %arg1: i32) -> (i32, i32) {
    %c0_i32 = arith.constant 0 : i32
    %c0_i32_0 = arith.constant 0 : i32
    %c0_i32_1 = arith.constant 0 : i32
    return %c0_i32, %c0_i32_0 : i32, i32
  }
  func.func @transform_14(%arg0: i32, %arg1: i32) -> (i32, i32) {
    %c0_i32 = arith.constant 0 : i32
    %c0_i32_0 = arith.constant 0 : i32
    %c0_i32_1 = arith.constant 0 : i32
    return %c0_i32, %c0_i32_0 : i32, i32
  }
  func.func @transform_15(%arg0: i32, %arg1: i32) -> (i32, i32) {
    %c0_i32 = arith.constant 0 : i32
    %c0_i32_0 = arith.constant 0 : i32
    %c0_i32_1 = arith.constant 0 : i32
    return %c0_i32, %c0_i32_0 : i32, i32
  }
  func.func @transform_16(%arg0: i32, %arg1: i32) -> (i32, i32) {
    %c0_i32 = arith.constant 0 : i32
    %c0_i32_0 = arith.constant 0 : i32
    %c0_i32_1 = arith.constant 0 : i32
    return %c0_i32, %c0_i32_0 : i32, i32
  }
  func.func @transform_17(%arg0: i32, %arg1: i32) -> (i32, i32) {
    %c0_i32 = arith.constant 0 : i32
    %c0_i32_0 = arith.constant 0 : i32
    %c0_i32_1 = arith.constant 0 : i32
    return %c0_i32, %c0_i32_0 : i32, i32
  }
  func.func @transform_18(%arg0: i32, %arg1: i32) -> (i32, i32) {
    %c0_i32 = arith.constant 0 : i32
    %c0_i32_0 = arith.constant 0 : i32
    %c0_i32_1 = arith.constant 0 : i32
    return %c0_i32, %c0_i32_0 : i32, i32
  }
  func.func @transform_19(%arg0: i32, %arg1: i32) -> (i32, i32, i32) {
    %c0_i32 = arith.constant 0 : i32
    %c0_i32_0 = arith.constant 0 : i32
    return %arg0, %arg1, %c0_i32 : i32, i32, i32
  }
}

module attributes {stable_mosaic.version = 11 : i64} {
  func.func @encoder_layer_kernel(%arg0: i32, %arg1: i32, %arg2: memref<1x16x32xf32, #tpu.memory_space<vmem>>, %arg3: memref<1x32x32xbf16, #tpu.memory_space<vmem>>, %arg4: memref<1x16x32xbf16, #tpu.memory_space<vmem>>, %arg5: memref<4x32x8xbf16, #tpu.memory_space<vmem>>, %arg6: memref<4x1x8xf32, #tpu.memory_space<vmem>>, %arg7: memref<4x32x8xbf16, #tpu.memory_space<vmem>>, %arg8: memref<4x1x8xf32, #tpu.memory_space<vmem>>, %arg9: memref<4x32x8xbf16, #tpu.memory_space<vmem>>, %arg10: memref<4x1x8xf32, #tpu.memory_space<vmem>>, %arg11: memref<4x8x32xbf16, #tpu.memory_space<vmem>>, %arg12: memref<1x32xf32, #tpu.memory_space<vmem>>, %arg13: memref<1x32xf32, #tpu.memory_space<vmem>>, %arg14: memref<1x32xf32, #tpu.memory_space<vmem>>, %arg15: memref<32x64xbf16, #tpu.memory_space<vmem>>, %arg16: memref<1x64xf32, #tpu.memory_space<vmem>>, %arg17: memref<64x32xbf16, #tpu.memory_space<vmem>>, %arg18: memref<1x32xf32, #tpu.memory_space<vmem>>, %arg19: memref<1x32xf32, #tpu.memory_space<vmem>>, %arg20: memref<1x32xf32, #tpu.memory_space<vmem>>, %arg21: memref<1x16x32xf32, #tpu.memory_space<vmem>>, %arg22: memref<4x32x8xbf16, #tpu.memory_space<vmem>>, %arg23: memref<4x32x8xbf16, #tpu.memory_space<vmem>>) attributes {dimension_semantics = [#tpu.dimension_semantics<parallel>, #tpu.dimension_semantics<arbitrary>], iteration_bounds = array<i64: 2, 2>, scalar_prefetch = 0 : i64, scratch_operands = 2 : i64, tpu.core_type = #tpu.core_type<tc>, window_params = [{transform_indices = @transform_0, window_bounds = array<i64: 1, 16, 32>}, {transform_indices = @transform_1, window_bounds = array<i64: 1, 32, 32>}, {transform_indices = @transform_2, window_bounds = array<i64: 1, 16, 32>}, {pipeline_mode = #tpu.pipeline_mode<synchronous>, transform_indices = @transform_3, window_bounds = array<i64: 4, 32, 8>}, {pipeline_mode = #tpu.pipeline_mode<synchronous>, transform_indices = @transform_4, window_bounds = array<i64: 4, 1, 8>}, {pipeline_mode = #tpu.pipeline_mode<synchronous>, transform_indices = @transform_5, window_bounds = array<i64: 4, 32, 8>}, {pipeline_mode = #tpu.pipeline_mode<synchronous>, transform_indices = @transform_6, window_bounds = array<i64: 4, 1, 8>}, {pipeline_mode = #tpu.pipeline_mode<synchronous>, transform_indices = @transform_7, window_bounds = array<i64: 4, 32, 8>}, {pipeline_mode = #tpu.pipeline_mode<synchronous>, transform_indices = @transform_8, window_bounds = array<i64: 4, 1, 8>}, {pipeline_mode = #tpu.pipeline_mode<synchronous>, transform_indices = @transform_9, window_bounds = array<i64: 4, 8, 32>}, {pipeline_mode = #tpu.pipeline_mode<synchronous>, transform_indices = @transform_10, window_bounds = array<i64: 1, 32>}, {pipeline_mode = #tpu.pipeline_mode<synchronous>, transform_indices = @transform_11, window_bounds = array<i64: 1, 32>}, {pipeline_mode = #tpu.pipeline_mode<synchronous>, transform_indices = @transform_12, window_bounds = array<i64: 1, 32>}, {pipeline_mode = #tpu.pipeline_mode<synchronous>, transform_indices = @transform_13, window_bounds = array<i64: 32, 64>}, {pipeline_mode = #tpu.pipeline_mode<synchronous>, transform_indices = @transform_14, window_bounds = array<i64: 1, 64>}, {pipeline_mode = #tpu.pipeline_mode<synchronous>, transform_indices = @transform_15, window_bounds = array<i64: 64, 32>}, {pipeline_mode = #tpu.pipeline_mode<synchronous>, transform_indices = @transform_16, window_bounds = array<i64: 1, 32>}, {pipeline_mode = #tpu.pipeline_mode<synchronous>, transform_indices = @transform_17, window_bounds = array<i64: 1, 32>}, {pipeline_mode = #tpu.pipeline_mode<synchronous>, transform_indices = @transform_18, window_bounds = array<i64: 1, 32>}, {transform_indices = @transform_19, window_bounds = array<i64: 1, 16, 32>}]} {
    %c0 = arith.constant 0 : index
    %c0_0 = arith.constant 0 : index
    %c0_1 = arith.constant 0 : index
    %0 = vector.load %arg2[%c0, %c0_0, %c0_1] : memref<1x16x32xf32, #tpu.memory_space<vmem>>, vector<1x16x32xf32>
    %1 = vector.shape_cast %0 : vector<1x16x32xf32> to vector<16x32xf32>
    %c0_2 = arith.constant 0 : index
    %c0_3 = arith.constant 0 : index
    %c0_4 = arith.constant 0 : index
    %2 = vector.load %arg4[%c0_2, %c0_3, %c0_4] : memref<1x16x32xbf16, #tpu.memory_space<vmem>>, vector<1x16x32xbf16>
    %3 = vector.shape_cast %2 : vector<1x16x32xbf16> to vector<16x32xbf16>
    %4 = arith.extf %3 : vector<16x32xbf16> to vector<16x32xf32>
    %c0_i32 = arith.constant 0 : i32
    %5 = arith.cmpi eq, %arg1, %c0_i32 : i32
    %6 = arith.extui %5 : i1 to i32
    %c0_i32_5 = arith.constant 0 : i32
    %7 = arith.cmpi ne, %6, %c0_i32_5 : i32
    scf.if %7 {
      %c0_41 = arith.constant 0 : index
      %c0_42 = arith.constant 0 : index
      %c0_43 = arith.constant 0 : index
      %81 = vector.load %arg3[%c0_41, %c0_42, %c0_43] : memref<1x32x32xbf16, #tpu.memory_space<vmem>>, vector<1x32x32xbf16>
      %82 = vector.shape_cast %81 : vector<1x32x32xbf16> to vector<32x32xbf16>
      %c0_i32_44 = arith.constant 0 : i32
      %c4_i32_45 = arith.constant 4 : i32
      %83 = arith.addi %c0_i32_44, %c4_i32_45 : i32
      %c1_i32_46 = arith.constant 1 : i32
      scf.for %arg24 = %c0_i32_44 to %83 step %c1_i32_46  : i32 {
        %84 = arith.index_cast %arg24 : i32 to index
        %c0_48 = arith.constant 0 : index
        %c0_49 = arith.constant 0 : index
        %85 = vector.load %arg7[%84, %c0_48, %c0_49] : memref<4x32x8xbf16, #tpu.memory_space<vmem>>, vector<1x32x8xbf16>
        %86 = vector.shape_cast %85 : vector<1x32x8xbf16> to vector<32x8xbf16>
        %cst_50 = arith.constant dense<0.000000e+00> : vector<32x8xf32>
        %87 = tpu.matmul %82, %86, %cst_50 {dimension_numbers = #tpu.dot_dimension_numbers<[1], [0], [0], [1], [0, 0, 1, 1], [], []>} : vector<32x32xbf16>, vector<32x8xbf16>, vector<32x8xf32> -> vector<32x8xf32>
        %88 = arith.index_cast %arg24 : i32 to index
        %c0_51 = arith.constant 0 : index
        %c0_52 = arith.constant 0 : index
        %89 = vector.load %arg8[%88, %c0_51, %c0_52] : memref<4x1x8xf32, #tpu.memory_space<vmem>>, vector<1x1x8xf32>
        %90 = vector.shape_cast %89 : vector<1x1x8xf32> to vector<1x8xf32>
        %91 = vector.broadcast %90 : vector<1x8xf32> to vector<32x8xf32>
        %92 = arith.addf %87, %91 : vector<32x8xf32>
        %93 = arith.index_cast %arg24 : i32 to index
        %c0_53 = arith.constant 0 : index
        %c0_54 = arith.constant 0 : index
        %94 = vector.load %arg9[%93, %c0_53, %c0_54] : memref<4x32x8xbf16, #tpu.memory_space<vmem>>, vector<1x32x8xbf16>
        %95 = vector.shape_cast %94 : vector<1x32x8xbf16> to vector<32x8xbf16>
        %cst_55 = arith.constant dense<0.000000e+00> : vector<32x8xf32>
        %96 = tpu.matmul %82, %95, %cst_55 {dimension_numbers = #tpu.dot_dimension_numbers<[1], [0], [0], [1], [0, 0, 1, 1], [], []>} : vector<32x32xbf16>, vector<32x8xbf16>, vector<32x8xf32> -> vector<32x8xf32>
        %97 = arith.index_cast %arg24 : i32 to index
        %c0_56 = arith.constant 0 : index
        %c0_57 = arith.constant 0 : index
        %98 = vector.load %arg10[%97, %c0_56, %c0_57] : memref<4x1x8xf32, #tpu.memory_space<vmem>>, vector<1x1x8xf32>
        %99 = vector.shape_cast %98 : vector<1x1x8xf32> to vector<1x8xf32>
        %100 = vector.broadcast %99 : vector<1x8xf32> to vector<32x8xf32>
        %101 = arith.addf %96, %100 : vector<32x8xf32>
        %102 = arith.truncf %92 : vector<32x8xf32> to vector<32x8xbf16>
        %103 = arith.index_cast %arg24 : i32 to index
        %c0_58 = arith.constant 0 : index
        %c0_59 = arith.constant 0 : index
        %104 = vector.load %arg22[%103, %c0_58, %c0_59] : memref<4x32x8xbf16, #tpu.memory_space<vmem>>, vector<1x32x8xbf16>
        %105 = vector.shape_cast %104 : vector<1x32x8xbf16> to vector<32x8xbf16>
        %106 = vector.shape_cast %102 : vector<32x8xbf16> to vector<1x32x8xbf16>
        tpu.vector_store %arg22[%103, %c0_58, %c0_59], %106 {strides = array<i32>} : memref<4x32x8xbf16, #tpu.memory_space<vmem>>, vector<1x32x8xbf16>,
        %107 = arith.truncf %101 : vector<32x8xf32> to vector<32x8xbf16>
        %108 = arith.index_cast %arg24 : i32 to index
        %c0_60 = arith.constant 0 : index
        %c0_61 = arith.constant 0 : index
        %109 = vector.load %arg23[%108, %c0_60, %c0_61] : memref<4x32x8xbf16, #tpu.memory_space<vmem>>, vector<1x32x8xbf16>
        %110 = vector.shape_cast %109 : vector<1x32x8xbf16> to vector<32x8xbf16>
        %111 = vector.shape_cast %107 : vector<32x8xbf16> to vector<1x32x8xbf16>
        tpu.vector_store %arg23[%108, %c0_60, %c0_61], %111 {strides = array<i32>} : memref<4x32x8xbf16, #tpu.memory_space<vmem>>, vector<1x32x8xbf16>,
      }
      %c4_i32_47 = arith.constant 4 : i32
    } else {
    }
    %8 = arith.truncf %1 : vector<16x32xf32> to vector<16x32xbf16>
    %c0_6 = arith.constant 0 : index
    %c0_7 = arith.constant 0 : index
    %9 = vector.load %arg12[%c0_6, %c0_7] : memref<1x32xf32, #tpu.memory_space<vmem>>, vector<1x32xf32>
    %10 = vector.shape_cast %9 : vector<1x32xf32> to vector<1x32xf32>
    %11 = vector.broadcast %10 : vector<1x32xf32> to vector<16x32xf32>
    %c0_i32_8 = arith.constant 0 : i32
    %c4_i32 = arith.constant 4 : i32
    %12 = arith.addi %c0_i32_8, %c4_i32 : i32
    %c1_i32 = arith.constant 1 : i32
    %13 = scf.for %arg24 = %c0_i32_8 to %12 step %c1_i32 iter_args(%arg25 = %11) -> (vector<16x32xf32>)  : i32 {
      %81 = arith.index_cast %arg24 : i32 to index
      %c0_41 = arith.constant 0 : index
      %c0_42 = arith.constant 0 : index
      %82 = vector.load %arg5[%81, %c0_41, %c0_42] : memref<4x32x8xbf16, #tpu.memory_space<vmem>>, vector<1x32x8xbf16>
      %83 = vector.shape_cast %82 : vector<1x32x8xbf16> to vector<32x8xbf16>
      %cst_43 = arith.constant dense<0.000000e+00> : vector<16x8xf32>
      %84 = tpu.matmul %8, %83, %cst_43 {dimension_numbers = #tpu.dot_dimension_numbers<[1], [0], [0], [1], [0, 0, 1, 1], [], []>} : vector<16x32xbf16>, vector<32x8xbf16>, vector<16x8xf32> -> vector<16x8xf32>
      %85 = arith.index_cast %arg24 : i32 to index
      %c0_44 = arith.constant 0 : index
      %c0_45 = arith.constant 0 : index
      %86 = vector.load %arg6[%85, %c0_44, %c0_45] : memref<4x1x8xf32, #tpu.memory_space<vmem>>, vector<1x1x8xf32>
      %87 = vector.shape_cast %86 : vector<1x1x8xf32> to vector<1x8xf32>
      %88 = vector.broadcast %87 : vector<1x8xf32> to vector<16x8xf32>
      %89 = arith.addf %84, %88 : vector<16x8xf32>
      %90 = arith.truncf %89 : vector<16x8xf32> to vector<16x8xbf16>
      %91 = arith.index_cast %arg24 : i32 to index
      %c0_46 = arith.constant 0 : index
      %c0_47 = arith.constant 0 : index
      %92 = vector.load %arg22[%91, %c0_46, %c0_47] : memref<4x32x8xbf16, #tpu.memory_space<vmem>>, vector<1x32x8xbf16>
      %93 = vector.shape_cast %92 : vector<1x32x8xbf16> to vector<32x8xbf16>
      %94 = arith.index_cast %arg24 : i32 to index
      %c0_48 = arith.constant 0 : index
      %c0_49 = arith.constant 0 : index
      %95 = vector.load %arg23[%94, %c0_48, %c0_49] : memref<4x32x8xbf16, #tpu.memory_space<vmem>>, vector<1x32x8xbf16>
      %96 = vector.shape_cast %95 : vector<1x32x8xbf16> to vector<32x8xbf16>
      %cst_50 = arith.constant dense<0.000000e+00> : vector<16x32xf32>
      %97 = tpu.matmul %90, %93, %cst_50 {dimension_numbers = #tpu.dot_dimension_numbers<[1], [1], [0], [0], [0, 0, 1, 0], [], []>} : vector<16x8xbf16>, vector<32x8xbf16>, vector<16x32xf32> -> vector<16x32xf32>
      %98 = arith.addf %97, %4 : vector<16x32xf32>
      %cst_51 = arith.constant dense<0xFF800000> : vector<16xf32>
      %99 = vector.multi_reduction <maximumf>, %98, %cst_51 [1] : vector<16x32xf32> to vector<16xf32>
      %100 = vector.shape_cast %99 : vector<16xf32> to vector<16x1xf32>
      %101 = vector.broadcast %100 : vector<16x1xf32> to vector<16x32xf32>
      %102 = arith.subf %98, %101 : vector<16x32xf32>
      %103 = math.exp %102 : vector<16x32xf32>
      %cst_52 = arith.constant dense<0.000000e+00> : vector<16xf32>
      %104 = vector.multi_reduction <add>, %103, %cst_52 [1] : vector<16x32xf32> to vector<16xf32>
      %105 = vector.shape_cast %104 : vector<16xf32> to vector<16x1xf32>
      %106 = tpu.reciprocal %105 {approx = true} : vector<16x1xf32> -> vector<16x1xf32>
      %107 = vector.broadcast %106 : vector<16x1xf32> to vector<16x32xf32>
      %108 = arith.mulf %103, %107 : vector<16x32xf32>
      %109 = arith.truncf %108 : vector<16x32xf32> to vector<16x32xbf16>
      %cst_53 = arith.constant dense<0.000000e+00> : vector<16x8xf32>
      %110 = tpu.matmul %109, %96, %cst_53 {dimension_numbers = #tpu.dot_dimension_numbers<[1], [0], [0], [1], [0, 0, 1, 1], [], []>} : vector<16x32xbf16>, vector<32x8xbf16>, vector<16x8xf32> -> vector<16x8xf32>
      %111 = arith.truncf %110 : vector<16x8xf32> to vector<16x8xbf16>
      %112 = arith.index_cast %arg24 : i32 to index
      %c0_54 = arith.constant 0 : index
      %c0_55 = arith.constant 0 : index
      %113 = vector.load %arg11[%112, %c0_54, %c0_55] : memref<4x8x32xbf16, #tpu.memory_space<vmem>>, vector<1x8x32xbf16>
      %114 = vector.shape_cast %113 : vector<1x8x32xbf16> to vector<8x32xbf16>
      %cst_56 = arith.constant dense<0.000000e+00> : vector<16x32xf32>
      %115 = tpu.matmul %111, %114, %cst_56 {dimension_numbers = #tpu.dot_dimension_numbers<[1], [0], [0], [1], [0, 0, 1, 1], [], []>} : vector<16x8xbf16>, vector<8x32xbf16>, vector<16x32xf32> -> vector<16x32xf32>
      %116 = arith.addf %arg25, %115 : vector<16x32xf32>
      scf.yield %116 : vector<16x32xf32>
    }
    %c4_i32_9 = arith.constant 4 : i32
    %14 = arith.addf %1, %13 : vector<16x32xf32>
    %c0_10 = arith.constant 0 : index
    %c0_11 = arith.constant 0 : index
    %15 = vector.load %arg13[%c0_10, %c0_11] : memref<1x32xf32, #tpu.memory_space<vmem>>, vector<1x32xf32>
    %c0_12 = arith.constant 0 : index
    %c0_13 = arith.constant 0 : index
    %16 = vector.load %arg14[%c0_12, %c0_13] : memref<1x32xf32, #tpu.memory_space<vmem>>, vector<1x32xf32>
    %cst = arith.constant dense<0.000000e+00> : vector<16xf32>
    %17 = vector.multi_reduction <add>, %14, %cst [1] : vector<16x32xf32> to vector<16xf32>
    %18 = vector.shape_cast %17 : vector<16xf32> to vector<16x1xf32>
    %cst_14 = arith.constant 3.200000e+01 : f32
    %19 = vector.broadcast %cst_14 : f32 to vector<16x1xf32>
    %20 = arith.divf %18, %19 : vector<16x1xf32>
    %21 = vector.broadcast %20 : vector<16x1xf32> to vector<16x32xf32>
    %22 = arith.subf %14, %21 : vector<16x32xf32>
    %23 = arith.mulf %22, %22 : vector<16x32xf32>
    %cst_15 = arith.constant dense<0.000000e+00> : vector<16xf32>
    %24 = vector.multi_reduction <add>, %23, %cst_15 [1] : vector<16x32xf32> to vector<16xf32>
    %25 = vector.shape_cast %24 : vector<16xf32> to vector<16x1xf32>
    %cst_16 = arith.constant 3.200000e+01 : f32
    %26 = vector.broadcast %cst_16 : f32 to vector<16x1xf32>
    %27 = arith.divf %25, %26 : vector<16x1xf32>
    %28 = vector.broadcast %20 : vector<16x1xf32> to vector<16x32xf32>
    %29 = arith.subf %14, %28 : vector<16x32xf32>
    %cst_17 = arith.constant 9.99999996E-13 : f32
    %30 = vector.broadcast %cst_17 : f32 to vector<16x1xf32>
    %31 = arith.addf %27, %30 : vector<16x1xf32>
    %32 = math.rsqrt %31 : vector<16x1xf32>
    %33 = vector.broadcast %32 : vector<16x1xf32> to vector<16x32xf32>
    %34 = arith.mulf %29, %33 : vector<16x32xf32>
    %35 = vector.broadcast %15 : vector<1x32xf32> to vector<16x32xf32>
    %36 = arith.mulf %34, %35 : vector<16x32xf32>
    %37 = vector.broadcast %16 : vector<1x32xf32> to vector<16x32xf32>
    %38 = arith.addf %36, %37 : vector<16x32xf32>
    %39 = arith.truncf %38 : vector<16x32xf32> to vector<16x32xbf16>
    %c0_18 = arith.constant 0 : index
    %c0_19 = arith.constant 0 : index
    %40 = vector.load %arg15[%c0_18, %c0_19] : memref<32x64xbf16, #tpu.memory_space<vmem>>, vector<32x64xbf16>
    %cst_20 = arith.constant dense<0.000000e+00> : vector<16x64xf32>
    %41 = tpu.matmul %39, %40, %cst_20 {dimension_numbers = #tpu.dot_dimension_numbers<[1], [0], [0], [1], [0, 0, 1, 1], [], []>} : vector<16x32xbf16>, vector<32x64xbf16>, vector<16x64xf32> -> vector<16x64xf32>
    %c0_21 = arith.constant 0 : index
    %c0_22 = arith.constant 0 : index
    %42 = vector.load %arg16[%c0_21, %c0_22] : memref<1x64xf32, #tpu.memory_space<vmem>>, vector<1x64xf32>
    %43 = vector.broadcast %42 : vector<1x64xf32> to vector<16x64xf32>
    %44 = arith.addf %41, %43 : vector<16x64xf32>
    %cst_23 = arith.constant 0.000000e+00 : f32
    %45 = vector.broadcast %cst_23 : f32 to vector<16x64xf32>
    %46 = arith.maximumf %44, %45 : vector<16x64xf32>
    %47 = arith.truncf %46 : vector<16x64xf32> to vector<16x64xbf16>
    %c0_24 = arith.constant 0 : index
    %c0_25 = arith.constant 0 : index
    %48 = vector.load %arg17[%c0_24, %c0_25] : memref<64x32xbf16, #tpu.memory_space<vmem>>, vector<64x32xbf16>
    %cst_26 = arith.constant dense<0.000000e+00> : vector<16x32xf32>
    %49 = tpu.matmul %47, %48, %cst_26 {dimension_numbers = #tpu.dot_dimension_numbers<[1], [0], [0], [1], [0, 0, 1, 1], [], []>} : vector<16x64xbf16>, vector<64x32xbf16>, vector<16x32xf32> -> vector<16x32xf32>
    %c0_27 = arith.constant 0 : index
    %c0_28 = arith.constant 0 : index
    %50 = vector.load %arg18[%c0_27, %c0_28] : memref<1x32xf32, #tpu.memory_space<vmem>>, vector<1x32xf32>
    %51 = vector.broadcast %50 : vector<1x32xf32> to vector<16x32xf32>
    %52 = arith.addf %49, %51 : vector<16x32xf32>
    %53 = arith.addf %38, %52 : vector<16x32xf32>
    %c0_29 = arith.constant 0 : index
    %c0_30 = arith.constant 0 : index
    %54 = vector.load %arg19[%c0_29, %c0_30] : memref<1x32xf32, #tpu.memory_space<vmem>>, vector<1x32xf32>
    %c0_31 = arith.constant 0 : index
    %c0_32 = arith.constant 0 : index
    %55 = vector.load %arg20[%c0_31, %c0_32] : memref<1x32xf32, #tpu.memory_space<vmem>>, vector<1x32xf32>
    %cst_33 = arith.constant dense<0.000000e+00> : vector<16xf32>
    %56 = vector.multi_reduction <add>, %53, %cst_33 [1] : vector<16x32xf32> to vector<16xf32>
    %57 = vector.shape_cast %56 : vector<16xf32> to vector<16x1xf32>
    %cst_34 = arith.constant 3.200000e+01 : f32
    %58 = vector.broadcast %cst_34 : f32 to vector<16x1xf32>
    %59 = arith.divf %57, %58 : vector<16x1xf32>
    %60 = vector.broadcast %59 : vector<16x1xf32> to vector<16x32xf32>
    %61 = arith.subf %53, %60 : vector<16x32xf32>
    %62 = arith.mulf %61, %61 : vector<16x32xf32>
    %cst_35 = arith.constant dense<0.000000e+00> : vector<16xf32>
    %63 = vector.multi_reduction <add>, %62, %cst_35 [1] : vector<16x32xf32> to vector<16xf32>
    %64 = vector.shape_cast %63 : vector<16xf32> to vector<16x1xf32>
    %cst_36 = arith.constant 3.200000e+01 : f32
    %65 = vector.broadcast %cst_36 : f32 to vector<16x1xf32>
    %66 = arith.divf %64, %65 : vector<16x1xf32>
    %67 = vector.broadcast %59 : vector<16x1xf32> to vector<16x32xf32>
    %68 = arith.subf %53, %67 : vector<16x32xf32>
    %cst_37 = arith.constant 9.99999996E-13 : f32
    %69 = vector.broadcast %cst_37 : f32 to vector<16x1xf32>
    %70 = arith.addf %66, %69 : vector<16x1xf32>
    %71 = math.rsqrt %70 : vector<16x1xf32>
    %72 = vector.broadcast %71 : vector<16x1xf32> to vector<16x32xf32>
    %73 = arith.mulf %68, %72 : vector<16x32xf32>
    %74 = vector.broadcast %54 : vector<1x32xf32> to vector<16x32xf32>
    %75 = arith.mulf %73, %74 : vector<16x32xf32>
    %76 = vector.broadcast %55 : vector<1x32xf32> to vector<16x32xf32>
    %77 = arith.addf %75, %76 : vector<16x32xf32>
    %c0_38 = arith.constant 0 : index
    %c0_39 = arith.constant 0 : index
    %c0_40 = arith.constant 0 : index
    %78 = vector.load %arg21[%c0_38, %c0_39, %c0_40] : memref<1x16x32xf32, #tpu.memory_space<vmem>>, vector<1x16x32xf32>
    %79 = vector.shape_cast %78 : vector<1x16x32xf32> to vector<16x32xf32>
    %80 = vector.shape_cast %77 : vector<16x32xf32> to vector<1x16x32xf32>
    tpu.vector_store %arg21[%c0_38, %c0_39, %c0_40], %80 {strides = array<i32>} : memref<1x16x32xf32, #tpu.memory_space<vmem>>, vector<1x16x32xf32>,
    return
  }
  func.func @transform_0(%arg0: i32, %arg1: i32) -> (i32, i32, i32) {
    %c0_i32 = arith.constant 0 : i32
    %c0_i32_0 = arith.constant 0 : i32
    return %arg0, %arg1, %c0_i32 : i32, i32, i32
  }
  func.func @transform_1(%arg0: i32, %arg1: i32) -> (i32, i32, i32) {
    %c0_i32 = arith.constant 0 : i32
    %c0_i32_0 = arith.constant 0 : i32
    %c0_i32_1 = arith.constant 0 : i32
    return %arg0, %c0_i32, %c0_i32_0 : i32, i32, i32
  }
  func.func @transform_2(%arg0: i32, %arg1: i32) -> (i32, i32, i32) {
    %c0_i32 = arith.constant 0 : i32
    %c0_i32_0 = arith.constant 0 : i32
    return %arg0, %arg1, %c0_i32 : i32, i32, i32
  }
  func.func @transform_3(%arg0: i32, %arg1: i32) -> (i32, i32, i32) {
    %c0_i32 = arith.constant 0 : i32
    %c0_i32_0 = arith.constant 0 : i32
    %c0_i32_1 = arith.constant 0 : i32
    %c0_i32_2 = arith.constant 0 : i32
    return %c0_i32, %c0_i32_0, %c0_i32_1 : i32, i32, i32
  }
  func.func @transform_4(%arg0: i32, %arg1: i32) -> (i32, i32, i32) {
    %c0_i32 = arith.constant 0 : i32
    %c0_i32_0 = arith.constant 0 : i32
    %c0_i32_1 = arith.constant 0 : i32
    %c0_i32_2 = arith.constant 0 : i32
    return %c0_i32, %c0_i32_0, %c0_i32_1 : i32, i32, i32
  }
  func.func @transform_5(%arg0: i32, %arg1: i32) -> (i32, i32, i32) {
    %c0_i32 = arith.constant 0 : i32
    %c0_i32_0 = arith.constant 0 : i32
    %c0_i32_1 = arith.constant 0 : i32
    %c0_i32_2 = arith.constant 0 : i32
    return %c0_i32, %c0_i32_0, %c0_i32_1 : i32, i32, i32
  }
  func.func @transform_6(%arg0: i32, %arg1: i32) -> (i32, i32, i32) {
    %c0_i32 = arith.constant 0 : i32
    %c0_i32_0 = arith.constant 0 : i32
    %c0_i32_1 = arith.constant 0 : i32
    %c0_i32_2 = arith.constant 0 : i32
    return %c0_i32, %c0_i32_0, %c0_i32_1 : i32, i32, i32
  }
  func.func @transform_7(%arg0: i32, %arg1: i32) -> (i32, i32, i32) {
    %c0_i32 = arith.constant 0 : i32
    %c0_i32_0 = arith.constant 0 : i32
    %c0_i32_1 = arith.constant 0 : i32
    %c0_i32_2 = arith.constant 0 : i32
    return %c0_i32, %c0_i32_0, %c0_i32_1 : i32, i32, i32
  }
  func.func @transform_8(%arg0: i32, %arg1: i32) -> (i32, i32, i32) {
    %c0_i32 = arith.constant 0 : i32
    %c0_i32_0 = arith.constant 0 : i32
    %c0_i32_1 = arith.constant 0 : i32
    %c0_i32_2 = arith.constant 0 : i32
    return %c0_i32, %c0_i32_0, %c0_i32_1 : i32, i32, i32
  }
  func.func @transform_9(%arg0: i32, %arg1: i32) -> (i32, i32, i32) {
    %c0_i32 = arith.constant 0 : i32
    %c0_i32_0 = arith.constant 0 : i32
    %c0_i32_1 = arith.constant 0 : i32
    %c0_i32_2 = arith.constant 0 : i32
    return %c0_i32, %c0_i32_0, %c0_i32_1 : i32, i32, i32
  }
  func.func @transform_10(%arg0: i32, %arg1: i32) -> (i32, i32) {
    %c0_i32 = arith.constant 0 : i32
    %c0_i32_0 = arith.constant 0 : i32
    %c0_i32_1 = arith.constant 0 : i32
    return %c0_i32, %c0_i32_0 : i32, i32
  }
  func.func @transform_11(%arg0: i32, %arg1: i32) -> (i32, i32) {
    %c0_i32 = arith.constant 0 : i32
    %c0_i32_0 = arith.constant 0 : i32
    %c0_i32_1 = arith.constant 0 : i32
    return %c0_i32, %c0_i32_0 : i32, i32
  }
  func.func @transform_12(%arg0: i32, %arg1: i32) -> (i32, i32) {
    %c0_i32 = arith.constant 0 : i32
    %c0_i32_0 = arith.constant 0 : i32
    %c0_i32_1 = arith.constant 0 : i32
    return %c0_i32, %c0_i32_0 : i32, i32
  }
  func.func @transform_13(%arg0: i32, %arg1: i32) -> (i32, i32) {
    %c0_i32 = arith.constant 0 : i32
    %c0_i32_0 = arith.constant 0 : i32
    %c0_i32_1 = arith.constant 0 : i32
    return %c0_i32, %c0_i32_0 : i32, i32
  }
  func.func @transform_14(%arg0: i32, %arg1: i32) -> (i32, i32) {
    %c0_i32 = arith.constant 0 : i32
    %c0_i32_0 = arith.constant 0 : i32
    %c0_i32_1 = arith.constant 0 : i32
    return %c0_i32, %c0_i32_0 : i32, i32
  }
  func.func @transform_15(%arg0: i32, %arg1: i32) -> (i32, i32) {
    %c0_i32 = arith.constant 0 : i32
    %c0_i32_0 = arith.constant 0 : i32
    %c0_i32_1 = arith.constant 0 : i32
    return %c0_i32, %c0_i32_0 : i32, i32
  }
  func.func @transform_16(%arg0: i32, %arg1: i32) -> (i32, i32) {
    %c0_i32 = arith.constant 0 : i32
    %c0_i32_0 = arith.constant 0 : i32
    %c0_i32_1 = arith.constant 0 : i32
    return %c0_i32, %c0_i32_0 : i32, i32
  }
  func.func @transform_17(%arg0: i32, %arg1: i32) -> (i32, i32) {
    %c0_i32 = arith.constant 0 : i32
    %c0_i32_0 = arith.constant 0 : i32
    %c0_i32_1 = arith.constant 0 : i32
    return %c0_i32, %c0_i32_0 : i32, i32
  }
  func.func @transform_18(%arg0: i32, %arg1: i32) -> (i32, i32) {
    %c0_i32 = arith.constant 0 : i32
    %c0_i32_0 = arith.constant 0 : i32
    %c0_i32_1 = arith.constant 0 : i32
    return %c0_i32, %c0_i32_0 : i32, i32
  }
  func.func @transform_19(%arg0: i32, %arg1: i32) -> (i32, i32, i32) {
    %c0_i32 = arith.constant 0 : i32
    %c0_i32_0 = arith.constant 0 : i32
    return %arg0, %arg1, %c0_i32 : i32, i32, i32
  }
}

</mosaic_0001>

<bundles_post_ra>
// kernel: tpu_custom_call.1
= control target key start
LH: loop header
LB: loop body
LE: loop exit
PB: predicated region body
PF: predicated region fallthrough
CT: control target
= control target key end

     0   :  { %s2545_s0 = inlined_call_operand.vmem [shape: f32[2,32,32], index: 0, kind: input, shape index: {}]   ;;  %s2546_s1 = inlined_call_operand.vmem [shape: bf16[2,32,32], index: 1, kind: input, shape index: {}]   ;;  %s2547_s2 = inlined_call_operand.vmem [shape: bf16[2,32,32], index: 2, kind: input, shape index: {}]   ;;  %s2548_s3 = inlined_call_operand.vmem [shape: bf16[4,32,8], index: 3, kind: input, shape index: {}]   ;;  %s2549_s4 = inlined_call_operand.vmem [shape: f32[4,1,8], index: 4, kind: input, shape index: {}]   ;;  %s2550_s5 = inlined_call_operand.vmem [shape: bf16[4,32,8], index: 5, kind: input, shape index: {}]   ;;  %s2551_s6 = inlined_call_operand.vmem [shape: f32[4,1,8], index: 6, kind: input, shape index: {}]   ;;  %s2552_s7 = inlined_call_operand.vmem [shape: bf16[4,32,8], index: 7, kind: input, shape index: {}]   ;;  %s2553_s8 = inlined_call_operand.vmem [shape: f32[4,1,8], index: 8, kind: input, shape index: {}]   ;;  %s2554_s9 = inlined_call_operand.vmem [shape: bf16[4,8,32], index: 9, kind: input, shape index: {}]   ;;  %s2555_s10 = inlined_call_operand.vmem [shape: f32[1,32], index: 10, kind: input, shape index: {}]   ;;  %s2556_s11 = inlined_call_operand.vmem [shape: f32[1,32], index: 11, kind: input, shape index: {}]   ;;  %s2557_s12 = inlined_call_operand.vmem [shape: f32[1,32], index: 12, kind: input, shape index: {}]   ;;  %s2558_s13 = inlined_call_operand.vmem [shape: bf16[32,64], index: 13, kind: input, shape index: {}]   ;;  %s2559_s14 = inlined_call_operand.vmem [shape: f32[1,64], index: 14, kind: input, shape index: {}]   ;;  %s2560_s15 = inlined_call_operand.vmem [shape: bf16[64,32], index: 15, kind: input, shape index: {}]   ;;  %s2561_s16 = inlined_call_operand.vmem [shape: f32[1,32], index: 16, kind: input, shape index: {}]   ;;  %s2562_s17 = inlined_call_operand.vmem [shape: f32[1,32], index: 17, kind: input, shape index: {}]   ;;  %s2563_s18 = inlined_call_operand.vmem [shape: f32[1,32], index: 18, kind: input, shape index: {}]   ;;  %s2564_s19 = inlined_call_operand.hbm [shape: f32[2,32,32], index: 19, kind: output, shape index: {}]  }
   0x1   :  { %2580 = sst [smem:[#allocation18_spill]] %s2545_s0 }
   0x2   :  { %2581 = sst [smem:[#allocation19_spill]] %s2546_s1 }
   0x3   :  { %2582 = sst [smem:[#allocation20_spill]] %s2547_s2 }
   0x4   :  { %2583 = sst [smem:[#allocation21_spill]] %s2548_s3 }
   0x5   :  { %2584 = sst [smem:[#allocation22_spill]] %s2556_s11 }
   0x6   :  { %2585 = sst [smem:[#allocation23_spill]] %s2557_s12 }
   0x7   :  { %2586 = sst [smem:[#allocation24_spill]] %s2559_s14 }
   0x8   :  { %2587 = sst [smem:[#allocation25_spill]] %s2560_s15 }
   0x9   :  { %2588 = sst [smem:[#allocation26_spill]] %s2561_s16 }
   0xa   :  { %2589 = sst [smem:[#allocation27_spill]] %s2562_s17 }
   0xb   :  { %2590 = sst [smem:[#allocation28_spill]] %s2563_s18 }
   0xc   :  { %2591 = sst [smem:[#allocation29_spill]] %s2564_s19 }
   0xd   :  { %24 = vsyncpa [#allocation5], 0 }
   0xe   :  { %26 = vsyncpa [#allocation5 + $0x1], 0  ;;  %s2195_s0 = smov 0   ;;  %s2197_s30 = smov 0  }
   0xf   :  { %s2199_s20 = smov 0   ;;  %s2201_s21 = smov 0  }
  0x10   :  { %s2203_s1 = smov 0   ;;  %s2205_s22 = smov 0  }
  0x11   :  { %s2207_s2 = smov 0   ;;  %s2209_s23 = smov 0  }
  0x12 LB: > { %2592 = sst [smem:[#allocation7_spill]] %s2042_s0  ;;  %s1631_s24 = sadd.s32 4294967295, %s2070_s23   ;;  %s2070_s23 = sphi %s2209_s23, %s32_s23   ;;  %s2066_s2 = sphi %s2207_s2, %s2632_s2   ;;  %s2062_s22 = sphi %s2205_s22, %s2631_s22   ;;  %s2058_s1 = sphi %s2203_s1, %s2630_s1   ;;  %s2054_s21 = sphi %s2201_s21, %s2629_s21   ;;  %s2050_s20 = sphi %s2199_s20, %s2628_s20   ;;  %s2046_s30 = sphi %s2197_s30, %s2627_s30   ;;  %s2042_s0 = sphi %s2195_s0, %s2626_s0  }
  0x13   : > { %2593 = sst [smem:[#allocation8_spill]] %s2046_s30  ;;  %s1632_s25 = sadd.s32 4294967294, %s2070_s23  }
  0x14   : > { %2594 = sst [smem:[#allocation9_spill]] %s2050_s20  ;;  %s41_s3 = sadd.s32 1, %s2062_s22 }
  0x15   : > { %2595 = sst [smem:[#allocation10_spill]] %s2062_s22  ;;  %p42_p0 = scmp.ge.s32.totalorder %s41_s3, 2 }
  0x16   : > { %2596 = sst [smem:[#allocation11_spill]] %s2066_s2  ;;  %s44_s26 = sadd.s32 1, %s2066_s2 }
  0x17   : > { %2597 = sst [smem:[#allocation12_spill]] %s2070_s23  ;;  %p481_p1 = scmp.ne.s32.totalorder %s2050_s20, %s2046_s30 }
  0x18   : > { %p482_p2 = scmp.eq.s32.totalorder %s1631_s24, 3  ;;  %s2634_s3 = smov (%p42_p0, %s41_s3), 0 }
  0x19   : > { %2598 = sst [smem:[#allocation13_spill]] %s2634_s3  ;;  %s2636_s26 = smov (!%p42_p0, %s44_s26), %s2066_s2 }
  0x1a   : > { %s467_s27 = ssub.s32 %s2062_s22, %s2634_s3  ;;  %p2246_p3 = por %p482_p2, %p481_p1 }
  0x1b   : > { %p46_p4 = scmp.ge.s32.totalorder %s2636_s26, 2  ;;  %p487_p5 = scmp.ne.s32.totalorder %s2046_s30, %s2042_s0 }
  0x1c   : > { %s2599_s28 = scalar_select %p2246_p3, 1, 0 }
  0x1d   : > { %p488_p6 = scmp.eq.s32.totalorder %s1632_s25, 3  ;;  %p1635_p7 = scmp.ge.s32.totalorder %s2070_s23, 1 }
  0x1e   : > { %2600 = sst [smem:[#allocation14_spill]] %s2599_s28  ;;  %s2638_s26 = smov (%p46_p4, %s2636_s26), 0 }
  0x1f   : > { %2601 = sst [smem:[#allocation15_spill]] %s2638_s26  ;;  %p2255_p8 = por %p488_p6, %p487_p5 }
  0x20   : > { %p588_p9 = scmp.lt.s32.totalorder %s2070_s23, 5  ;;  %s466_s24 = ssub.s32 %s2066_s2, %s2638_s26 }
  0x21   : > { %s2602_s29 = scalar_select %p2255_p8, 1, 0 }
  0x22   : > { %s471_s19 = sadd.s32 1, %s2050_s20  ;;  %s468_s18 = sor.u32 %s467_s27, %s466_s24 }
  0x23   : > { %2603 = sst [smem:[#allocation16_spill]] %s2602_s29  ;;  %p589_p10 = pnand %p1635_p7, %p588_p9 }
  0x24   : > { %p469_p11 = scmp.eq.s32.totalorder %s468_s18, 0  ;;  %s2578_s25 = sand.u32 (!%p589_p10), 1, %s2046_s30  }
  0x25   : > { %592 = sbr.rel (%p589_p10) target bundleno = 2441 (0x989), region = 96  ;;  %s2268_s22 = sshll.u32 (!%p589_p10), %s2054_s21, 1 }
  0x26   : > { %s2264_s3 = scalar_select %p469_p11, %s2050_s20, %s471_s19  }
  0x27   : > { %s1636_s29 = sshll.u32 (!%p589_p10), %s2578_s25, 4  ;;  %p663_p12 = scmp.lt.s32.totalorder (!%p589_p10), %s2058_s1, 1 }
  0x28   : > { %2604 = sst [smem:[#allocation17_spill]] %s2264_s3  ;;  %p665_p13 = scmp.lt.s32.totalorder (!%p589_p10), %s2268_s22, 3 }
  0x29   : > { %s2605_s20 = sld [smem:[#allocation19_spill]] (!%p589_p10)  ;;  %p1645_p0 = scmp.ne.s32.totalorder (!%p589_p10), %s2054_s21, 0 }
  0x2a   : > { %s664_s27 = scalar_select %p663_p12, %s2058_s1, 1 }
  0x2b   : > { %s666_s24 = scalar_select %p665_p13, %s2268_s22, 3 }
  0x2c   : > { %s1638_s18 = sshll.u32 %s664_s27, 2  ;;  %s1708_s19 = sshll.u32 %s664_s27, 4 }
  0x2d   : > { %s668_s26 = sadd.s32 %s1638_s18, %s666_s24  ;;  %s2606_s14 = sld [smem:[#allocation18_spill]] }
  0x2e   : > { %s1639_s23 = sshll.u32 %s668_s26, 3  ;;  %s1644_s28 = sshll.u32 %s668_s26, 2 }
  0x2f   : > { %s676_s0 = scalar_lea.vmem %s2605_s20, %s1708_s19  ;;  %s2607_s25 = sld [smem:[#allocation20_spill]] }
  0x30   : > { %s2293_s20 = scalar_lea.vmem [#allocation4], %s1636_s29  ;;  %s2304_s11 = smov (!%p1645_p0), 0  }
  0x33   : > { %s670_s30 = scalar_lea.vmem %s2606_s14, %s1639_s23  ;;  %698 = sbr.rel (%p1645_p0) target bundleno = 274 (0x112), region = 100 }
  0x34   : > { %v2285_v0 = vld [vmem:[%s670_s30] sm:$0xff]  ;;  %v2287_v1 = vld [vmem:[%s670_s30 + $0x8] sm:$0xff] }
  0x35   : > { %s685_s15 = scalar_lea.vmem %s2607_s25, %s1644_s28 }
  0x36   : > { %v2289_v2 = vld [vmem:[%s685_s15] sm:$0xff]  }
  0x37   : > { %v1726_v3 = vunpack.c.l.bf16 %v2289_v2  ;;  %v1727_v4 = vunpack.c.h.bf16 %v2289_v2 }
  0x38   : > { %v2296_v5 = vld [vmem:[%s676_s0] sm:$0xf]  ;;  %v2298_v6 = vld [vmem:[%s676_s0 + $0x4] sm:$0xf]  ;;  %v2300_v7 = vld [vmem:[%s676_s0 + $0x8] sm:$0xf] }
  0x39   : > { %v2302_v8 = vld [vmem:[%s676_s0 + $0xc] sm:$0xf] }
  0x3a LB: >> { %v1649_v9 = vcombine.low %v2296_v5, %v2298_v6  ;;  %vm746_vm0 = vcmask 261120   ;;  %s2312_s12 = sshll.u32 %s2074_s11, 4  ;;  %v1650_v14 = vcombine.low %v2300_v7, %v2302_v8  ;;  %s716_s23 = scalar_lea.vmem %s2551_s6, %s2074_s11  ;;  %vm895_vm1 = vcmask 60416   ;;  %s2074_s11 = sphi %s2304_s11, %s708_s11  }
  0x3b   : >> { %s711_s16 = scalar_lea.vmem %s2550_s5, %s2312_s12  ;;  %s803_s30 = scalar_lea.vmem %s2552_s7, %s2312_s12  ;;  %v1648_v15 = vld [vmem:[%s716_s23] ss:$0 sm:$0xff] }
  0x3c   : >> { %1759 = vmatprep.mubr.msk.bf16.mxu0 %vm746_vm0, %v1649_v9  ;;  %1767 = vmatprep.mubr.msk.bf16.mxu1 %vm746_vm0, %v1649_v9  ;;  %v1930_v10 = vld [vmem:[%s711_s16 + $0x8] sm:$0xff]   ;;  %v1932_v12 = vld [vmem:[%s711_s16] sm:$0xff]   ;;  %s808_s28 = scalar_lea.vmem %s2553_s8, %s2074_s11  ;;  %s894_s29 = scalar_lea.vmem [#allocation2], %s2312_s12 }
  0x3d   : >> { %v1931_v11 = vld [vmem:[%s803_s30 + $0x8] sm:$0xff]   ;;  %1755 = vmatprep.subr.bf16.mxu0 %v1930_v10  ;;  %v1933_v13 = vld [vmem:[%s803_s30] sm:$0xff]   ;;  %s917_s25 = scalar_lea.vmem [#allocation3], %s2312_s12  ;;  %s708_s11 = sadd.s32 1, %s2074_s11  }
  0x3e   : >> { %1763 = vmatprep.subr.bf16.mxu1 %v1931_v11  ;;  %1756 = vmatpush3.bf16.msra.mxu0 %v1930_v10  ;;  %v1656_v16 = vld [vmem:[%s808_s28] ss:$0 sm:$0xff]  ;;  %p705_p1 = scmp.ge.s32.totalorder %s708_s11, 4  }
  0x3f   : >> { %1764 = vmatpush3.bf16.msra.mxu1 %v1931_v11  ;;  %1757 = vmatprep.subr.bf16.mxu0 %v1932_v12 }
  0x40   : >> { %1765 = vmatprep.subr.bf16.mxu1 %v1933_v13 }
  0x42   : >> { %1758 = vmatpush3.bf16.msra.mxu0 %v1932_v12 }
  0x43   : >> { %1766 = vmatpush3.bf16.msra.mxu1 %v1933_v13 }
  0x45   : >> { %1760 = vmatmul.mubr.msk.bf16.vlgmr.msra.gmra.mxu0 %vm746_vm0, %v1650_v14 }
  0x46   : >> { %1768 = vmatmul.mubr.msk.bf16.vlgmr.msra.gmra.mxu1 %vm746_vm0, %v1650_v14 }
 0x105   : >> { %v1761_v17 = vpop.f32.mrf.mxu0 }
 0x106   : >> { %v796_v18 = vadd.f32 %v1761_v17, %v1648_v15  ;;  %v1769_v19 = vpop.f32.mrf.mxu1 }
 0x107   : >> { %v871_v20 = vadd.f32 %v1769_v19, %v1656_v16  ;;  %v787_v21 = vpop.f32.mrf.mxu0 }
 0x108   : >> { %v1713_v22 = vpack.c.bf16 %v796_v18, %v796_v18  ;;  %v788_v23 = vadd.f32 %v1648_v15, %v787_v21  ;;  %v862_v24 = vpop.f32.mrf.mxu1 }
 0x109   : >> { %v1718_v25 = vpack.c.bf16 %v871_v20, %v871_v20  ;;  %v863_v26 = vadd.f32 %v1656_v16, %v862_v24  ;;  %v1762_v27 = vpop.f32.mrf.mxu0 }
 0x10a   : >> { %898 = vst.msk [vmem:[%s894_s29 + $0x8] sm:$0xf] %vm895_vm1, %v1713_v22  ;;  %v1711_v28 = vpack.c.bf16 %v788_v23, %v788_v23  ;;  %v799_v29 = vadd.f32 %v1762_v27, %v1648_v15  ;;  %v1770_v30 = vpop.f32.mrf.mxu1 }
 0x10b   : >> { %920 = vst.msk [vmem:[%s917_s25 + $0x8] sm:$0xf] %vm895_vm1, %v1718_v25  ;;  %v1716_v31 = vpack.c.bf16 %v863_v26, %v863_v26  ;;  %v874_v32 = vadd.f32 %v1770_v30, %v1656_v16  ;;  %v790_v33 = vpop.f32.mrf.mxu0 }
 0x10c   : >> { %896 = vst.msk [vmem:[%s894_s29] sm:$0xf] %vm895_vm1, %v1711_v28  ;;  %v1714_v34 = vpack.c.bf16 %v799_v29, %v799_v29  ;;  %v791_v35 = vadd.f32 %v1648_v15, %v790_v33  ;;  %v865_v36 = vpop.f32.mrf.mxu1 }
 0x10d   : >> { %918 = vst.msk [vmem:[%s917_s25] sm:$0xf] %vm895_vm1, %v1716_v31  ;;  %v1719_v37 = vpack.c.bf16 %v874_v32, %v874_v32  ;;  %v866_v38 = vadd.f32 %v1656_v16, %v865_v36  ;;  %707 = sbr.rel (!%p705_p1) target bundleno = 58 (0x3a), region = 166 }
 0x10e   : >> { %899 = vst.msk [vmem:[%s894_s29 + $0xc] sm:$0xf] %vm895_vm1, %v1714_v34  ;;  %v1712_v39 = vpack.c.bf16 %v791_v35, %v791_v35 }
 0x10f   : >> { %921 = vst.msk [vmem:[%s917_s25 + $0xc] sm:$0xf] %vm895_vm1, %v1719_v37  ;;  %v1717_v40 = vpack.c.bf16 %v866_v38, %v866_v38 }
 0x110   : >> { %897 = vst.msk [vmem:[%s894_s29 + $0x4] sm:$0xf] %vm895_vm1, %v1712_v39 }
 0x111   : >> { %919 = vst.msk [vmem:[%s917_s25 + $0x4] sm:$0xf] %vm895_vm1, %v1717_v40 }
 0x112 PF: > { %v922_v41 = vpack.c.bf16 %v2287_v1, %v2285_v0  ;;  %v1671_v42 = vld [vmem:[%s2555_s10] ss:$0 sm:$0xff]   ;;  %s2358_s18 = smov 0  }
 0x113   : > { %v2608_v43 = vmov %v1671_v42 }
 0x114 LB: >> { %v2088_v44 = vmov 0.0   ;;  %vm2089_vm2 = vmmov 0   ;;  %s2373_s19 = sshll.u32 %s2086_s18, 4  ;;  %s2609_s14 = sld [smem:[#allocation21_spill]]  ;;  %vm1033_vm3 = vcmask 64512   ;;  %vm965_vm4 = vcmask 261120   ;;  %s2086_s18 = sphi %s2358_s18, %s935_s18   ;;  %v2082_v42 = vphi %v1671_v42, %v2611_v42   ;;  %v2078_v43 = vphi %v2608_v43, %v2610_v43  }
 0x115   : >> { %1771 = vmatprep.subr.bf16.mxu0 %v2088_v44  ;;  %1775 = vmatprep.mubr.msk.bf16.mxu0 %vm2089_vm2, %v2088_v44  ;;  %s1012_s16 = scalar_lea.vmem [#allocation2], %s2373_s19  ;;  %s1018_s17 = scalar_lea.vmem [#allocation3], %s2373_s19  ;;  %vm1170_vm5 = vcmask 1043456  }
 0x116   : >> { %1779 = vmatprep.subr.bf16.mxu1 %v2088_v44  ;;  %1783 = vmatprep.mubr.msk.bf16.mxu1 %vm2089_vm2, %v2088_v44  ;;  %s945_s21 = scalar_lea.vmem %s2549_s4, %s2086_s18  ;;  %s1686_s2 = sshll.u32 %s2086_s18, 2 }
 0x117   : >> { %v1936_v47 = vld [vmem:[%s1012_s16 + $0x8] sm:$0xff]   ;;  %v1937_v49 = vld [vmem:[%s1012_s16] sm:$0xff]   ;;  %s1165_s26 = scalar_lea.vmem %s2554_s9, %s1686_s2  ;;  %s935_s18 = sadd.s32 1, %s2086_s18  }
 0x118   : >> { %v1041_v48 = vsel %vm1033_vm3, %v1936_v47, 0  ;;  %v1038_v50 = vsel %vm1033_vm3, %v1937_v49, 0  ;;  %v1674_v52 = vld [vmem:[%s945_s21] ss:$0 sm:$0xff]  ;;  %v1938_v18 = vld [vmem:[%s1018_s17 + $0x8] sm:$0xff]   ;;  %p932_p2 = scmp.ge.s32.totalorder %s935_s18, 4  }
 0x119   : >> { %1780 = vmatpush3.bf16.xpose.msra.mxu1 %v1041_v48  ;;  %v1939_v19 = vld [vmem:[%s1018_s17] sm:$0xff]   ;;  %vm2091_vm6 = vmmov (%p932_p2), 0   ;;  %s2614_s17 = sld [smem:[#allocation23_spill]] (%p932_p2)  ;;  %vm1375_vm7 = vcmask (%p932_p2), 523264   ;;  %s1704_s18 = sshll.u32 (%p932_p2), %s2058_s1, 2 }
 0x11a   : >> { %s940_s15 = scalar_lea.vmem %s2609_s14, %s2373_s19  ;;  %1781 = vmatprep.subr.bf16.mxu1 %v2088_v44  ;;  %v1166_v24 = vld [vmem:[%s1165_s26] sm:$0xf]  ;;  %s2612_s19 = sld [smem:[#allocation25_spill]] (%p932_p2) }
 0x11b   : >> { %v1934_v45 = vld [vmem:[%s940_s15 + $0x8] sm:$0xff]   ;;  %v1935_v46 = vld [vmem:[%s940_s15] sm:$0xff]   ;;  %v1172_v28 = vsel %vm1170_vm5, %v1166_v24, 0  ;;  %s2613_s14 = sld [smem:[#allocation22_spill]] (%p932_p2)  ;;  %s1481_s30 = sadd.s32 (%p932_p2), %s1704_s18, %s2268_s22 }
 0x11c   : >> { %1772 = vmatpush3.bf16.msra.mxu0 %v1934_v45  ;;  %s2615_s29 = sld [smem:[#allocation24_spill]] (%p932_p2)  ;;  %s1705_s2 = sshll.u32 (%p932_p2), %s1481_s30, 7 }
 0x11d   : >> { %1773 = vmatprep.subr.bf16.mxu0 %v2088_v44  ;;  %s2616_s24 = sld [smem:[#allocation26_spill]] (%p932_p2)  ;;  %s1484_s1 = sshll.u32 (%p932_p2), %s2293_s20, 4  ;;  %s2488_s1 = int_to_ptr.vmem [resolvable:$true] %s1484_s1 }
 0x11e   : > { %s2618_s15 = sld [smem:[#allocation8_spill]] (%p932_p2)  ;;  %s1962_s25 = scalar_lea.vmem (%p932_p2), %s2488_s1, 256 }
 0x11f   : > { %s2619_s0 = sld [smem:[#allocation28_spill]] (%p932_p2)  ;;  %p1963_p4 = scmp.ne.s32.totalorder (%p932_p2), %s2488_s1, %s1962_s25 }
 0x120   : >> { %1774 = vmatpush3.bf16.msra.mxu0 %v1935_v46  ;;  %s2621_s26 = sld [smem:[#allocation29_spill]] (%p932_p2)  ;;  %s2092_s27 = smov (%p932_p2), [#allocation4]  }
 0x121   : >> { %1787 = vmatprep.subr.bf16.mxu0 %v2088_v44  ;;  %1782 = vmatpush3.bf16.xpose.msra.mxu1 %v1038_v50  ;;  %p1964_p5 = pnand (%p932_p2), %p1963_p4, %p2246_p3 }
 0x123   : >> { %1776 = vmatmul.mubr.msk.bf16.vlgmr.msra.gmra.mxu0 %vm965_vm4, %v922_v41  ;;  %v1950_v41 = vld [vmem:[%s2612_s19 + $0x18] sm:$0xff] (%p932_p2)   ;;  %v1694_v24 = vld [vmem:[%s2616_s24] ss:$0 sm:$0xff] (%p932_p2)  ;;  %p1965_p6 = pneg (%p932_p2), %p1964_p5  ;;  %s1966_s24 = sshll.u32 (%p932_p2), %s2092_s27, 4  ;;  %s1967_s24 = int_to_ptr.vmem [resolvable:$false] %s1966_s24 }
 0x124   : >> { %1791 = vmatprep.mubr.msk.bf16.mxu0 %vm2089_vm2, %v2088_v44  ;;  %1788 = vmatpush3.bf16.msra.mxu0 %v1938_v18  ;;  %s2622_s22 = sand.u32 (%p932_p2), 1, %s2618_s15   ;;  %s1968_s18 = scalar_lea.vmem (%p932_p2), %s1967_s24, 512 }
 0x125   : >> { %1789 = vmatprep.subr.bf16.mxu0 %v2088_v44  ;;  %p1969_p7 = scmp.lt.s32.totalorder (%p932_p2), %s2488_s1, %s1967_s24  ;;  %p1970_p9 = scmp.lt.s32.totalorder (%p932_p2), %s1968_s18, %s1962_s25 }
 0x126   : > { %s2486_s28 = scalar_lea.hbm (%p932_p2), %s2621_s26, %s1705_s2 }
 0x127   : > { %p1971_p10 = por (%p932_p2), %p1970_p9, %p1969_p7 }
 0x128   : >> { %1790 = vmatpush3.bf16.msra.mxu0 %v1939_v19 }
 0x129   : >> { %1795 = vmatprep.subr.bf16.mxu0 %v2088_v44  ;;  %p1972_p11 = pnand (%p932_p2), %p1971_p10, %p1965_p6 }
 0x1e3   : >> { %v1003_v51 = vpop.f32.mrf.mxu0 }
 0x1e4   : >> { %v1004_v55 = vadd.f32 %v1674_v52, %v1003_v51 }
 0x1e5   : >> { %v1777_v53 = vpop.f32.mrf.mxu0 }
 0x1e7   : >> { %v1006_v54 = vpop.f32.mrf.mxu0 }
 0x1e8   : >> { %v1007_v56 = vadd.f32 %v1674_v52, %v1006_v54 }
 0x1e9   : >> { %v1778_v57 = vpop.f32.mrf.mxu0 }
 0x1ea   : >> { %v1010_v58 = vpack.c.bf16 %v1007_v56, %v1004_v55 }
 0x1ec   : >> { %1784 = vmatmul.mubr.msk.bf16.vlgmr.msra.gmra.mxu1 %vm1033_vm3, %v1010_v58 }
 0x2ac   : >> { %v1077_v59 = vpop.f32.mrf.mxu1 }
 0x2ad   : >> { %v1078_v60 = vadd.f32 %v1726_v3, %v1077_v59  ;;  %v2090_v3 = vmov (%p932_p2), 0.0  }
 0x2ae   : >> { %v1785_v61 = vpop.f32.mrf.mxu1  ;;  %1809 = vmatprep.subr.bf16.mxu1 (%p932_p2), %v2090_v3  ;;  %1817 = vmatprep.mubr.msk.bf16.mxu1 (%p932_p2), %vm2091_vm6, %v2090_v3 }
 0x2af   : >> { %v1084_v62 = vsel %vm965_vm4, %v1078_v60, -inf  ;;  %1810 = vmatpush3.bf16.msra.mxu1 (%p932_p2), %v1950_v41  ;;  %v1688_v61 = vld [vmem:[%s2613_s14] ss:$0 sm:$0xff] (%p932_p2)  ;;  %s2617_s14 = sld [smem:[#allocation27_spill]] (%p932_p2) }
 0x2b0   : >> { %1085 = vmax.xlane.f32.xlu0 %v1084_v62  ;;  %v1080_v63 = vpop.f32.mrf.mxu1  ;;  %1811 = vmatprep.subr.bf16.mxu1 (%p932_p2), %v2090_v3 }
 0x2b1   : >> { %v1081_v5 = vadd.f32 %v1727_v4, %v1080_v63  ;;  %v1949_v4 = vld [vmem:[%s2558_s13] sm:$0xff] (%p932_p2)  }
 0x2b2   : >> { %v1786_v6 = vpop.f32.mrf.mxu1 }
 0x2b3   : >> { %v1087_v7 = vsel %vm965_vm4, %v1081_v5, -inf  ;;  %v1689_v6 = vld [vmem:[%s2614_s17] ss:$0 sm:$0xff] (%p932_p2) }
 0x2b4   : >> { %1088 = vmax.xlane.f32.xlu0 %v1087_v7 }
 0x339   : >> { %v1086_v8 = vpop.xlane.xlu0 %1085 }
 0x33a   : >> { %v1090_v9 = vsub.f32 %v1078_v60, %v1086_v8 }
 0x33c   : >> { %v1092_v10 = vmul.f32 1.442695, %v1090_v9 }
 0x33d   : >> { %v1089_v11 = vpop.xlane.xlu0 %1088 }
 0x33e   : >> { %1940 = vpow2.f32 %v1092_v10  ;;  %v1091_v12 = vsub.f32 %v1081_v5, %v1089_v11  ;;  %v1951_v11 = vld [vmem:[%s2612_s19 + $0x10] sm:$0xff] (%p932_p2)  }
 0x33f   : > { %1812 = vmatpush3.bf16.msra.mxu1 (%p932_p2), %v1951_v11 }
 0x340   : >> { %v1094_v13 = vmul.f32 1.442695, %v1091_v12  ;;  %1813 = vmatprep.subr.bf16.mxu1 (%p932_p2), %v2090_v3  ;;  %v1952_v12 = vld [vmem:[%s2612_s19 + $0x8] sm:$0xff] (%p932_p2)  }
 0x342   : >> { %1942 = vpow2.f32 %v1094_v13  ;;  %v1953_v13 = vld [vmem:[%s2612_s19] sm:$0xff] (%p932_p2)  }
 0x343   : > { %1814 = vmatpush3.bf16.msra.mxu1 (%p932_p2), %v1952_v12 }
 0x344   : > { %1815 = vmatprep.subr.bf16.mxu1 (%p932_p2), %v2090_v3 }
 0x347   : > { %1816 = vmatpush3.bf16.msra.mxu1 (%p932_p2), %v1953_v13 }
 0x34b   : >> { %v1941_v14 = vpop.eup %1940 }
 0x34c   : >> { %v1096_v15 = vsel %vm965_vm4, %v1941_v14, 0.0 }
 0x34d   : >> { %1097 = vadd.xlane.f32.xlu1 %v1096_v15 }
 0x34f   : >> { %v1943_v16 = vpop.eup %1942 }
 0x350   : >> { %v1099_v17 = vsel %vm965_vm4, %v1943_v16, 0.0 }
 0x351   : >> { %1100 = vadd.xlane.f32.xlu1 %v1099_v17 }
 0x3d6   : >> { %v1098_v20 = vpop.xlane.xlu1 %1097 }
 0x3d7   : >> { %1944 = vrcp.f32 %v1098_v20 }
 0x3da   : >> { %v1101_v21 = vpop.xlane.xlu1 %1100 }
 0x3db   : >> { %1946 = vrcp.f32 %v1101_v21 }
 0x3e4   : >> { %v1945_v22 = vpop.eup %1944 }
 0x3e5   : >> { %v1104_v26 = vmul.f32 %v1945_v22, %v1941_v14  ;;  %v1690_v14 = vld [vmem:[%s2615_s29] ss:$0 sm:$0xff] (%p932_p2)  ;;  %s2494_s29 = scalar_lea.sflag (%p932_p2), [#allocation5], %s2622_s22 }
 0x3e8   : >> { %v1947_v23 = vpop.eup %1946 }
 0x3e9   : >> { %v1105_v25 = vmul.f32 %v1947_v23, %v1943_v16 }
 0x3eb   : >> { %v1106_v27 = vpack.c.bf16 %v1105_v25, %v1104_v26 }
 0x3ed   : >> { %1792 = vmatmul.mubr.msk.bf16.vlgmr.msra.gmra.mxu0 %vm965_vm4, %v1106_v27 }
 0x3ee   : >> { %1796 = vmatpush3.bf16.msra.mxu0 %v1172_v28  ;;  %1797 = vmatprep.mubr.msk.bf16.mxu0 %vm2089_vm2, %v2088_v44 }
 0x3ef   : > { %1801 = vmatprep.subr.bf16.mxu0 (%p932_p2), %v2090_v3 }
 0x4ad   : >> { %v1156_v29 = vpop.f32.mrf.mxu0 }
 0x4af   : >> { %v1793_v30 = vpop.f32.mrf.mxu0 }
 0x4b1   : >> { %v1159_v31 = vpop.f32.mrf.mxu0 }
 0x4b2   : >> { %v1163_v32 = vpack.c.bf16 %v1159_v31, %v1156_v29 }
 0x4b3   : >> { %v1794_v33 = vpop.f32.mrf.mxu0 }
 0x4b4   : >> { %1798 = vmatmul.mubr.msk.bf16.vlgmr.msra.gmra.mxu0 %vm1033_vm3, %v1163_v32 }
 0x4b5   : > { %1805 = vmatprep.mubr.msk.bf16.mxu0 (%p932_p2), %vm2091_vm6, %v2090_v3 }
 0x574   : >> { %v1208_v34 = vpop.f32.mrf.mxu0 }
 0x575   : >> { %v1215_v35 = vadd.f32 %v2082_v42, %v1208_v34  }
 0x576   : >> { %v1799_v36 = vpop.f32.mrf.mxu0 }
 0x577   : >> { %v2611_v42 = vmov %v1215_v35  ;;  %934 = sbr.rel (!%p932_p2) target bundleno = 276 (0x114), region = 177  ;;  %v1217_v40 = vadd.f32 (%p932_p2), %v1215_v35, %v2285_v0 }
 0x578   : >> { %v1211_v37 = vpop.f32.mrf.mxu0 }
 0x579   : >> { %v1216_v38 = vadd.f32 %v2078_v43, %v1211_v37   ;;  %v1222_v42 = vsel (%p932_p2), %vm965_vm4, %v1217_v40, 0.0 }
 0x57a   : >> { %v1800_v39 = vpop.f32.mrf.mxu0  ;;  %1223 = vadd.xlane.f32.xlu0 (%p932_p2), %v1222_v42 }
 0x57b   : >> { %v2610_v43 = vmov %v1216_v38  ;;  %v1218_v44 = vadd.f32 (%p932_p2), %v1216_v38, %v2287_v1  ;;  %v1948_v1 = vld [vmem:[%s2558_s13 + $0x8] sm:$0xff] (%p932_p2)  }
 0x57c   : > { %1802 = vmatpush3.bf16.msra.mxu0 %v1948_v1  ;;  %v1701_v1 = vld [vmem:[%s2619_s0] ss:$0 sm:$0xff] }
 0x57d   : > { %v1225_v45 = vsel %vm965_vm4, %v1218_v44, 0.0  ;;  %1803 = vmatprep.subr.bf16.mxu0 %v2090_v3 }
 0x57e   : > { %1226 = vadd.xlane.f32.xlu0 %v1225_v45 }
 0x580   : > { %1804 = vmatpush3.bf16.msra.mxu0 %v1949_v4 }
 0x603   : > { %v1224_v46 = vpop.xlane.xlu0 %1223 }
 0x604   : > { %v1229_v47 = vmul.f32 0.03125, %v1224_v46 }
 0x606   : > { %v1231_v48 = vsub.f32 %v1217_v40, %v1229_v47 }
 0x607   : > { %v1227_v49 = vpop.xlane.xlu0 %1226 }
 0x608   : > { %v1230_v50 = vmul.f32 0.03125, %v1227_v49  ;;  %v1233_v51 = vmul.f32 %v1231_v48, %v1231_v48 }
 0x60a   : > { %v1232_v52 = vsub.f32 %v1218_v44, %v1230_v50  ;;  %v1235_v53 = vsel %vm965_vm4, %v1233_v51, 0.0 }
 0x60b   : > { %1236 = vadd.xlane.f32.xlu1 %v1235_v53 }
 0x60c   : > { %v1234_v2 = vmul.f32 %v1232_v52, %v1232_v52 }
 0x60e   : > { %v1238_v0 = vsel %vm965_vm4, %v1234_v2, 0.0  ;;  %v1700_v2 = vld [vmem:[%s2617_s14] ss:$0 sm:$0xff] }
 0x60f   : > { %1239 = vadd.xlane.f32.xlu1 %v1238_v0 }
 0x694   : > { %v1237_v43 = vpop.xlane.xlu1 %1236 }
 0x695   : > { %v1241_v54 = vmul.f32 0.03125, %v1237_v43 }
 0x697   : > { %v1243_v55 = vadd.f32 1e-12, %v1241_v54 }
 0x698   : > { %v1240_v56 = vpop.xlane.xlu1 %1239 }
 0x699   : > { %1954 = vrsqrt.f32 %v1243_v55  ;;  %v1242_v57 = vmul.f32 0.03125, %v1240_v56 }
 0x69b   : > { %v1244_v58 = vadd.f32 1e-12, %v1242_v57 }
 0x69d   : > { %1956 = vrsqrt.f32 %v1244_v58 }
 0x6a6   : > { %v1955_v59 = vpop.eup %1954 }
 0x6a7   : > { %v1247_v60 = vmul.f32 %v1955_v59, %v1231_v48 }
 0x6a9   : > { %v1255_v5 = vmul.f32 %v1688_v61, %v1247_v60 }
 0x6aa   : > { %v1957_v62 = vpop.eup %1956 }
 0x6ab   : > { %v1248_v63 = vmul.f32 %v1957_v62, %v1232_v52  ;;  %v1263_v8 = vadd.f32 %v1689_v6, %v1255_v5 }
 0x6ad   : > { %v1256_v7 = vmul.f32 %v1688_v61, %v1248_v63 }
 0x6af   : > { %v1264_v9 = vadd.f32 %v1689_v6, %v1256_v7 }
 0x6b1   : > { %v1265_v10 = vpack.c.bf16 %v1264_v9, %v1263_v8 }
 0x6b3   : > { %1806 = vmatmul.mubr.msk.bf16.vlgmr.msra.gmra.mxu0 %vm965_vm4, %v1265_v10 }
 0x773   : > { %v1326_v15 = vpop.f32.mrf.mxu0 }
 0x774   : > { %v1327_v17 = vadd.f32 %v1690_v14, %v1326_v15 }
 0x775   : > { %v1807_v16 = vpop.f32.mrf.mxu0 }
 0x776   : > { %v1333_v21 = vmax.f32 %v1327_v17, 0.0 }
 0x777   : > { %v1329_v18 = vpop.f32.mrf.mxu0 }
 0x778   : > { %v1330_v19 = vadd.f32 %v1690_v14, %v1329_v18 }
 0x779   : > { %v1808_v20 = vpop.f32.mrf.mxu0 }
 0x77a   : > { %v1334_v22 = vmax.f32 %v1330_v19, 0.0 }
 0x77c   : > { %v1335_v23 = vpack.c.bf16 %v1334_v22, %v1333_v21 }
 0x77e   : > { %1818 = vmatmul.mubr.msk.bf16.vlgmr.msra.gmra.mxu1 %vm1375_vm7, %v1335_v23 }
 0x83e   : > { %v1413_v25 = vpop.f32.mrf.mxu1 }
 0x83f   : > { %v1414_v26 = vadd.f32 %v1694_v24, %v1413_v25 }
 0x840   : > { %v1819_v27 = vpop.f32.mrf.mxu1 }
 0x841   : > { %v1420_v28 = vadd.f32 %v1414_v26, %v1263_v8 }
 0x842   : > { %v1416_v29 = vpop.f32.mrf.mxu1 }
 0x843   : > { %v1417_v30 = vadd.f32 %v1694_v24, %v1416_v29  ;;  %v1424_v31 = vsel %vm965_vm4, %v1420_v28, 0.0 }
 0x844   : > { %1425 = vadd.xlane.f32.xlu0 %v1424_v31  ;;  %v1820_v32 = vpop.f32.mrf.mxu1 }
 0x845   : > { %v1421_v33 = vadd.f32 %v1417_v30, %v1264_v9 }
 0x847   : > { %v1427_v34 = vsel %vm965_vm4, %v1421_v33, 0.0 }
 0x848   : > { %1428 = vadd.xlane.f32.xlu1 %v1427_v34 }
 0x8cd   : > { %v1426_v35 = vpop.xlane.xlu0 %1425 }
 0x8ce   : > { %v1430_v36 = vmul.f32 0.03125, %v1426_v35 }
 0x8d0   : > { %v1432_v37 = vsub.f32 %v1420_v28, %v1430_v36 }
 0x8d1   : > { %v1429_v38 = vpop.xlane.xlu1 %1428 }
 0x8d2   : > { %v1431_v39 = vmul.f32 0.03125, %v1429_v38  ;;  %v1434_v40 = vmul.f32 %v1432_v37, %v1432_v37 }
 0x8d4   : > { %v1433_v44 = vsub.f32 %v1421_v33, %v1431_v39  ;;  %v1436_v42 = vsel %vm965_vm4, %v1434_v40, 0.0 }
 0x8d5   : > { %1437 = vadd.xlane.f32.xlu0 %v1436_v42 }
 0x8d6   : > { %v1435_v45 = vmul.f32 %v1433_v44, %v1433_v44 }
 0x8d8   : > { %v1439_v46 = vsel %vm965_vm4, %v1435_v45, 0.0 }
 0x8d9   : > { %1440 = vadd.xlane.f32.xlu1 %v1439_v46 }
 0x95e   : > { %v1438_v47 = vpop.xlane.xlu0 %1437 }
 0x95f   : > { %v1442_v48 = vmul.f32 0.03125, %v1438_v47 }
 0x961   : > { %v1444_v49 = vadd.f32 1e-12, %v1442_v48 }
 0x962   : > { %v1441_v50 = vpop.xlane.xlu1 %1440 }
 0x963   : > { %1958 = vrsqrt.f32 %v1444_v49  ;;  %v1443_v51 = vmul.f32 0.03125, %v1441_v50 }
 0x965   : > { %v1445_v52 = vadd.f32 1e-12, %v1443_v51 }
 0x967   : > { %1960 = vrsqrt.f32 %v1445_v52 }
 0x970   : > { %v1959_v53 = vpop.eup %1958 }
 0x971   : > { %v1448_v0 = vmul.f32 %v1959_v53, %v1432_v37 }
 0x973   : > { %v1456_v3 = vmul.f32 %v1700_v2, %v1448_v0 }
 0x974   : > { %v1961_v4 = vpop.eup %1960 }
 0x975   : > { %v1449_v41 = vmul.f32 %v1961_v4, %v1433_v44  ;;  %v1464_v43 = vadd.f32 %v1701_v1, %v1456_v3 }
 0x977   : > { %v1457_v54 = vmul.f32 %v1700_v2, %v1449_v41  ;;  %1466 = vst.msk [vmem:[%s2293_s20] sm:$0xff] %vm965_vm4, %v1464_v43 }
 0x979   : > { %v1465_v55 = vadd.f32 %v1701_v1, %v1457_v54 }
 0x97b   : > { %1467 = vst.msk [vmem:[%s2293_s20 + $0x8] sm:$0xff] %vm965_vm4, %v1465_v55 }
 0x97c   : > { %1975 = shalt.err (!%p1972_p11)
}
 0x97d   : > { %s1976_s20 = scalar_lea.hbm %s2486_s28, 256  ;;  %s1980_s14 = scalar_lea.hbm %s2621_s26, 1024 }
 0x97e   : > { %p1977_p12 = scmp.ne.s32.totalorder %s2486_s28, %s1976_s20  ;;  %p1981_p1 = scmp.lt.s32.totalorder %s2486_s28, %s2621_s26 }
 0x97f   : > { %p1982_p2 = scmp.lt.s32.totalorder %s1980_s14, %s1976_s20 }
 0x980   : > { %p1978_p13 = pnand %p1977_p12, %p2246_p3 }
 0x981   : > { %p1983_p4 = por %p1982_p2, %p1981_p1 }
 0x982   : > { %p1979_p0 = pneg %p1978_p13 }
 0x984   : > { %p1984_p5 = pnand %p1983_p4, %p1979_p0 }
 0x986   : > { %1987 = shalt.err (!%p1984_p5)
}
 0x987   : > { %s2093_s17 = smov 128   ;;  %s2094_s0 = smov 8  }
 0x988   : > { %1821 = dma.vmem_to_hbm [thread:$0]  (%p2246_p3), %s2488_s1, 256, %s2486_s28, %s2494_s29, %s2093_s17, %s2093_s17, %s2094_s0  }
 0x989 PF: > { %s2623_s30 = sld [smem:[#allocation12_spill]] }
 0x98a   : > { %s2624_s2 = sld [smem:[#allocation7_spill]] }
 0x98f   : > { %p1827_p6 = scmp.ge.s32.totalorder %s2623_s30, 2 }
 0x990   : > { %s1499_s3 = sand.u32 1, %s2624_s2  }
 0x991   : > { %p1824_p7 = pnand %p1827_p6, %p2255_p8  ;;  %s1500_s22 = scalar_lea.sflag [#allocation5], %s1499_s3 }
 0x993   : > { %p1825_p9 = pneg %p1824_p7 }
 0x995   : > { %2037 = dma.done.wait (%p1825_p9), %s1500_s22, 256  }
 0x996   : > { %2039 = vsyncadd (%p1825_p9), %s1500_s22, 4294967040  ;;  %s32_s23 = sadd.s32 1, %s2623_s30   ;;  %s2626_s0 = sld [smem:[#allocation8_spill]] }
 0x997   : > { %p29_p10 = scmp.ge.s32.totalorder %s32_s23, 6   ;;  %s2627_s30 = sld [smem:[#allocation9_spill]] }
 0x998   : > { %s2628_s20 = sld [smem:[#allocation17_spill]] }
 0x999   : > { %s2629_s21 = sld [smem:[#allocation10_spill]]  ;;  %31 = sbr.rel (!%p29_p10) target bundleno = 18 (0x12), region = 188 }
 0x99a   : > { %s2630_s1 = sld [smem:[#allocation11_spill]] }
 0x99b   : > { %s2631_s22 = sld [smem:[#allocation13_spill]] }
 0x99c   : > { %s2632_s2 = sld [smem:[#allocation15_spill]] }
 0x99e   :  { %1505 = vsyncpa [#allocation5], 1 }
 0x99f   :  { %1507 = vsyncpa [#allocation5 + $0x1], 1 }

// kernel: tpu_custom_call.1
= control target key start
LH: loop header
LB: loop body
LE: loop exit
PB: predicated region body
PF: predicated region fallthrough
CT: control target
= control target key end

     0   :  { %s2545_s0 = inlined_call_operand.vmem [shape: f32[2,32,32], index: 0, kind: input, shape index: {}]   ;;  %s2546_s1 = inlined_call_operand.vmem [shape: bf16[2,32,32], index: 1, kind: input, shape index: {}]   ;;  %s2547_s2 = inlined_call_operand.vmem [shape: bf16[2,32,32], index: 2, kind: input, shape index: {}]   ;;  %s2548_s3 = inlined_call_operand.vmem [shape: bf16[4,32,8], index: 3, kind: input, shape index: {}]   ;;  %s2549_s4 = inlined_call_operand.vmem [shape: f32[4,1,8], index: 4, kind: input, shape index: {}]   ;;  %s2550_s5 = inlined_call_operand.vmem [shape: bf16[4,32,8], index: 5, kind: input, shape index: {}]   ;;  %s2551_s6 = inlined_call_operand.vmem [shape: f32[4,1,8], index: 6, kind: input, shape index: {}]   ;;  %s2552_s7 = inlined_call_operand.vmem [shape: bf16[4,32,8], index: 7, kind: input, shape index: {}]   ;;  %s2553_s8 = inlined_call_operand.vmem [shape: f32[4,1,8], index: 8, kind: input, shape index: {}]   ;;  %s2554_s9 = inlined_call_operand.vmem [shape: bf16[4,8,32], index: 9, kind: input, shape index: {}]   ;;  %s2555_s10 = inlined_call_operand.vmem [shape: f32[1,32], index: 10, kind: input, shape index: {}]   ;;  %s2556_s11 = inlined_call_operand.vmem [shape: f32[1,32], index: 11, kind: input, shape index: {}]   ;;  %s2557_s12 = inlined_call_operand.vmem [shape: f32[1,32], index: 12, kind: input, shape index: {}]   ;;  %s2558_s13 = inlined_call_operand.vmem [shape: bf16[32,64], index: 13, kind: input, shape index: {}]   ;;  %s2559_s14 = inlined_call_operand.vmem [shape: f32[1,64], index: 14, kind: input, shape index: {}]   ;;  %s2560_s15 = inlined_call_operand.vmem [shape: bf16[64,32], index: 15, kind: input, shape index: {}]   ;;  %s2561_s16 = inlined_call_operand.vmem [shape: f32[1,32], index: 16, kind: input, shape index: {}]   ;;  %s2562_s17 = inlined_call_operand.vmem [shape: f32[1,32], index: 17, kind: input, shape index: {}]   ;;  %s2563_s18 = inlined_call_operand.vmem [shape: f32[1,32], index: 18, kind: input, shape index: {}]   ;;  %s2564_s19 = inlined_call_operand.hbm [shape: f32[2,32,32], index: 19, kind: output, shape index: {}]  }
   0x1   :  { %2580 = sst [smem:[#allocation18_spill]] %s2545_s0 }
   0x2   :  { %2581 = sst [smem:[#allocation19_spill]] %s2546_s1 }
   0x3   :  { %2582 = sst [smem:[#allocation20_spill]] %s2547_s2 }
   0x4   :  { %2583 = sst [smem:[#allocation21_spill]] %s2548_s3 }
   0x5   :  { %2584 = sst [smem:[#allocation22_spill]] %s2556_s11 }
   0x6   :  { %2585 = sst [smem:[#allocation23_spill]] %s2557_s12 }
   0x7   :  { %2586 = sst [smem:[#allocation24_spill]] %s2559_s14 }
   0x8   :  { %2587 = sst [smem:[#allocation25_spill]] %s2560_s15 }
   0x9   :  { %2588 = sst [smem:[#allocation26_spill]] %s2561_s16 }
   0xa   :  { %2589 = sst [smem:[#allocation27_spill]] %s2562_s17 }
   0xb   :  { %2590 = sst [smem:[#allocation28_spill]] %s2563_s18 }
   0xc   :  { %2591 = sst [smem:[#allocation29_spill]] %s2564_s19 }
   0xd   :  { %24 = vsyncpa [#allocation5], 0 }
   0xe   :  { %26 = vsyncpa [#allocation5 + $0x1], 0  ;;  %s2195_s0 = smov 0   ;;  %s2197_s30 = smov 0  }
   0xf   :  { %s2199_s20 = smov 0   ;;  %s2201_s21 = smov 0  }
  0x10   :  { %s2203_s1 = smov 0   ;;  %s2205_s22 = smov 0  }
  0x11   :  { %s2207_s2 = smov 0   ;;  %s2209_s23 = smov 0  }
  0x12 LB: > { %2592 = sst [smem:[#allocation7_spill]] %s2042_s0  ;;  %s1631_s24 = sadd.s32 4294967295, %s2070_s23   ;;  %s2070_s23 = sphi %s2209_s23, %s32_s23   ;;  %s2066_s2 = sphi %s2207_s2, %s2632_s2   ;;  %s2062_s22 = sphi %s2205_s22, %s2631_s22   ;;  %s2058_s1 = sphi %s2203_s1, %s2630_s1   ;;  %s2054_s21 = sphi %s2201_s21, %s2629_s21   ;;  %s2050_s20 = sphi %s2199_s20, %s2628_s20   ;;  %s2046_s30 = sphi %s2197_s30, %s2627_s30   ;;  %s2042_s0 = sphi %s2195_s0, %s2626_s0  }
  0x13   : > { %2593 = sst [smem:[#allocation8_spill]] %s2046_s30  ;;  %s1632_s25 = sadd.s32 4294967294, %s2070_s23  }
  0x14   : > { %2594 = sst [smem:[#allocation9_spill]] %s2050_s20  ;;  %s41_s3 = sadd.s32 1, %s2062_s22 }
  0x15   : > { %2595 = sst [smem:[#allocation10_spill]] %s2062_s22  ;;  %p42_p0 = scmp.ge.s32.totalorder %s41_s3, 2 }
  0x16   : > { %2596 = sst [smem:[#allocation11_spill]] %s2066_s2  ;;  %s44_s26 = sadd.s32 1, %s2066_s2 }
  0x17   : > { %2597 = sst [smem:[#allocation12_spill]] %s2070_s23  ;;  %p481_p1 = scmp.ne.s32.totalorder %s2050_s20, %s2046_s30 }
  0x18   : > { %p482_p2 = scmp.eq.s32.totalorder %s1631_s24, 3  ;;  %s2634_s3 = smov (%p42_p0, %s41_s3), 0 }
  0x19   : > { %2598 = sst [smem:[#allocation13_spill]] %s2634_s3  ;;  %s2636_s26 = smov (!%p42_p0, %s44_s26), %s2066_s2 }
  0x1a   : > { %s467_s27 = ssub.s32 %s2062_s22, %s2634_s3  ;;  %p2246_p3 = por %p482_p2, %p481_p1 }
  0x1b   : > { %p46_p4 = scmp.ge.s32.totalorder %s2636_s26, 2  ;;  %p487_p5 = scmp.ne.s32.totalorder %s2046_s30, %s2042_s0 }
  0x1c   : > { %s2599_s28 = scalar_select %p2246_p3, 1, 0 }
  0x1d   : > { %p488_p6 = scmp.eq.s32.totalorder %s1632_s25, 3  ;;  %p1635_p7 = scmp.ge.s32.totalorder %s2070_s23, 1 }
  0x1e   : > { %2600 = sst [smem:[#allocation14_spill]] %s2599_s28  ;;  %s2638_s26 = smov (%p46_p4, %s2636_s26), 0 }
  0x1f   : > { %2601 = sst [smem:[#allocation15_spill]] %s2638_s26  ;;  %p2255_p8 = por %p488_p6, %p487_p5 }
  0x20   : > { %p588_p9 = scmp.lt.s32.totalorder %s2070_s23, 5  ;;  %s466_s24 = ssub.s32 %s2066_s2, %s2638_s26 }
  0x21   : > { %s2602_s29 = scalar_select %p2255_p8, 1, 0 }
  0x22   : > { %s471_s19 = sadd.s32 1, %s2050_s20  ;;  %s468_s18 = sor.u32 %s467_s27, %s466_s24 }
  0x23   : > { %2603 = sst [smem:[#allocation16_spill]] %s2602_s29  ;;  %p589_p10 = pnand %p1635_p7, %p588_p9 }
  0x24   : > { %p469_p11 = scmp.eq.s32.totalorder %s468_s18, 0  ;;  %s2578_s25 = sand.u32 (!%p589_p10), 1, %s2046_s30  }
  0x25   : > { %592 = sbr.rel (%p589_p10) target bundleno = 2441 (0x989), region = 96  ;;  %s2268_s22 = sshll.u32 (!%p589_p10), %s2054_s21, 1 }
  0x26   : > { %s2264_s3 = scalar_select %p469_p11, %s2050_s20, %s471_s19  }
  0x27   : > { %s1636_s29 = sshll.u32 (!%p589_p10), %s2578_s25, 4  ;;  %p663_p12 = scmp.lt.s32.totalorder (!%p589_p10), %s2058_s1, 1 }
  0x28   : > { %2604 = sst [smem:[#allocation17_spill]] %s2264_s3  ;;  %p665_p13 = scmp.lt.s32.totalorder (!%p589_p10), %s2268_s22, 3 }
  0x29   : > { %s2605_s20 = sld [smem:[#allocation19_spill]] (!%p589_p10)  ;;  %p1645_p0 = scmp.ne.s32.totalorder (!%p589_p10), %s2054_s21, 0 }
  0x2a   : > { %s664_s27 = scalar_select %p663_p12, %s2058_s1, 1 }
  0x2b   : > { %s666_s24 = scalar_select %p665_p13, %s2268_s22, 3 }
  0x2c   : > { %s1638_s18 = sshll.u32 %s664_s27, 2  ;;  %s1708_s19 = sshll.u32 %s664_s27, 4 }
  0x2d   : > { %s668_s26 = sadd.s32 %s1638_s18, %s666_s24  ;;  %s2606_s14 = sld [smem:[#allocation18_spill]] }
  0x2e   : > { %s1639_s23 = sshll.u32 %s668_s26, 3  ;;  %s1644_s28 = sshll.u32 %s668_s26, 2 }
  0x2f   : > { %s676_s0 = scalar_lea.vmem %s2605_s20, %s1708_s19  ;;  %s2607_s25 = sld [smem:[#allocation20_spill]] }
  0x30   : > { %s2293_s20 = scalar_lea.vmem [#allocation4], %s1636_s29  ;;  %s2304_s11 = smov (!%p1645_p0), 0  }
  0x33   : > { %s670_s30 = scalar_lea.vmem %s2606_s14, %s1639_s23  ;;  %698 = sbr.rel (%p1645_p0) target bundleno = 274 (0x112), region = 100 }
  0x34   : > { %v2285_v0 = vld [vmem:[%s670_s30] sm:$0xff]  ;;  %v2287_v1 = vld [vmem:[%s670_s30 + $0x8] sm:$0xff] }
  0x35   : > { %s685_s15 = scalar_lea.vmem %s2607_s25, %s1644_s28 }
  0x36   : > { %v2289_v2 = vld [vmem:[%s685_s15] sm:$0xff]  }
  0x37   : > { %v1726_v3 = vunpack.c.l.bf16 %v2289_v2  ;;  %v1727_v4 = vunpack.c.h.bf16 %v2289_v2 }
  0x38   : > { %v2296_v5 = vld [vmem:[%s676_s0] sm:$0xf]  ;;  %v2298_v6 = vld [vmem:[%s676_s0 + $0x4] sm:$0xf]  ;;  %v2300_v7 = vld [vmem:[%s676_s0 + $0x8] sm:$0xf] }
  0x39   : > { %v2302_v8 = vld [vmem:[%s676_s0 + $0xc] sm:$0xf] }
  0x3a LB: >> { %v1649_v9 = vcombine.low %v2296_v5, %v2298_v6  ;;  %vm746_vm0 = vcmask 261120   ;;  %s2312_s12 = sshll.u32 %s2074_s11, 4  ;;  %v1650_v14 = vcombine.low %v2300_v7, %v2302_v8  ;;  %s716_s23 = scalar_lea.vmem %s2551_s6, %s2074_s11  ;;  %vm895_vm1 = vcmask 60416   ;;  %s2074_s11 = sphi %s2304_s11, %s708_s11  }
  0x3b   : >> { %s711_s16 = scalar_lea.vmem %s2550_s5, %s2312_s12  ;;  %s803_s30 = scalar_lea.vmem %s2552_s7, %s2312_s12  ;;  %v1648_v15 = vld [vmem:[%s716_s23] ss:$0 sm:$0xff] }
  0x3c   : >> { %1759 = vmatprep.mubr.msk.bf16.mxu0 %vm746_vm0, %v1649_v9  ;;  %1767 = vmatprep.mubr.msk.bf16.mxu1 %vm746_vm0, %v1649_v9  ;;  %v1930_v10 = vld [vmem:[%s711_s16 + $0x8] sm:$0xff]   ;;  %v1932_v12 = vld [vmem:[%s711_s16] sm:$0xff]   ;;  %s808_s28 = scalar_lea.vmem %s2553_s8, %s2074_s11  ;;  %s894_s29 = scalar_lea.vmem [#allocation2], %s2312_s12 }
  0x3d   : >> { %v1931_v11 = vld [vmem:[%s803_s30 + $0x8] sm:$0xff]   ;;  %1755 = vmatprep.subr.bf16.mxu0 %v1930_v10  ;;  %v1933_v13 = vld [vmem:[%s803_s30] sm:$0xff]   ;;  %s917_s25 = scalar_lea.vmem [#allocation3], %s2312_s12  ;;  %s708_s11 = sadd.s32 1, %s2074_s11  }
  0x3e   : >> { %1763 = vmatprep.subr.bf16.mxu1 %v1931_v11  ;;  %1756 = vmatpush3.bf16.msra.mxu0 %v1930_v10  ;;  %v1656_v16 = vld [vmem:[%s808_s28] ss:$0 sm:$0xff]  ;;  %p705_p1 = scmp.ge.s32.totalorder %s708_s11, 4  }
  0x3f   : >> { %1764 = vmatpush3.bf16.msra.mxu1 %v1931_v11  ;;  %1757 = vmatprep.subr.bf16.mxu0 %v1932_v12 }
  0x40   : >> { %1765 = vmatprep.subr.bf16.mxu1 %v1933_v13 }
  0x42   : >> { %1758 = vmatpush3.bf16.msra.mxu0 %v1932_v12 }
  0x43   : >> { %1766 = vmatpush3.bf16.msra.mxu1 %v1933_v13 }
  0x45   : >> { %1760 = vmatmul.mubr.msk.bf16.vlgmr.msra.gmra.mxu0 %vm746_vm0, %v1650_v14 }
  0x46   : >> { %1768 = vmatmul.mubr.msk.bf16.vlgmr.msra.gmra.mxu1 %vm746_vm0, %v1650_v14 }
 0x105   : >> { %v1761_v17 = vpop.f32.mrf.mxu0 }
 0x106   : >> { %v796_v18 = vadd.f32 %v1761_v17, %v1648_v15  ;;  %v1769_v19 = vpop.f32.mrf.mxu1 }
 0x107   : >> { %v871_v20 = vadd.f32 %v1769_v19, %v1656_v16  ;;  %v787_v21 = vpop.f32.mrf.mxu0 }
 0x108   : >> { %v1713_v22 = vpack.c.bf16 %v796_v18, %v796_v18  ;;  %v788_v23 = vadd.f32 %v1648_v15, %v787_v21  ;;  %v862_v24 = vpop.f32.mrf.mxu1 }
 0x109   : >> { %v1718_v25 = vpack.c.bf16 %v871_v20, %v871_v20  ;;  %v863_v26 = vadd.f32 %v1656_v16, %v862_v24  ;;  %v1762_v27 = vpop.f32.mrf.mxu0 }
 0x10a   : >> { %898 = vst.msk [vmem:[%s894_s29 + $0x8] sm:$0xf] %vm895_vm1, %v1713_v22  ;;  %v1711_v28 = vpack.c.bf16 %v788_v23, %v788_v23  ;;  %v799_v29 = vadd.f32 %v1762_v27, %v1648_v15  ;;  %v1770_v30 = vpop.f32.mrf.mxu1 }
 0x10b   : >> { %920 = vst.msk [vmem:[%s917_s25 + $0x8] sm:$0xf] %vm895_vm1, %v1718_v25  ;;  %v1716_v31 = vpack.c.bf16 %v863_v26, %v863_v26  ;;  %v874_v32 = vadd.f32 %v1770_v30, %v1656_v16  ;;  %v790_v33 = vpop.f32.mrf.mxu0 }
 0x10c   : >> { %896 = vst.msk [vmem:[%s894_s29] sm:$0xf] %vm895_vm1, %v1711_v28  ;;  %v1714_v34 = vpack.c.bf16 %v799_v29, %v799_v29  ;;  %v791_v35 = vadd.f32 %v1648_v15, %v790_v33  ;;  %v865_v36 = vpop.f32.mrf.mxu1 }
 0x10d   : >> { %918 = vst.msk [vmem:[%s917_s25] sm:$0xf] %vm895_vm1, %v1716_v31  ;;  %v1719_v37 = vpack.c.bf16 %v874_v32, %v874_v32  ;;  %v866_v38 = vadd.f32 %v1656_v16, %v865_v36  ;;  %707 = sbr.rel (!%p705_p1) target bundleno = 58 (0x3a), region = 166 }
 0x10e   : >> { %899 = vst.msk [vmem:[%s894_s29 + $0xc] sm:$0xf] %vm895_vm1, %v1714_v34  ;;  %v1712_v39 = vpack.c.bf16 %v791_v35, %v791_v35 }
 0x10f   : >> { %921 = vst.msk [vmem:[%s917_s25 + $0xc] sm:$0xf] %vm895_vm1, %v1719_v37  ;;  %v1717_v40 = vpack.c.bf16 %v866_v38, %v866_v38 }
 0x110   : >> { %897 = vst.msk [vmem:[%s894_s29 + $0x4] sm:$0xf] %vm895_vm1, %v1712_v39 }
 0x111   : >> { %919 = vst.msk [vmem:[%s917_s25 + $0x4] sm:$0xf] %vm895_vm1, %v1717_v40 }
 0x112 PF: > { %v922_v41 = vpack.c.bf16 %v2287_v1, %v2285_v0  ;;  %v1671_v42 = vld [vmem:[%s2555_s10] ss:$0 sm:$0xff]   ;;  %s2358_s18 = smov 0  }
 0x113   : > { %v2608_v43 = vmov %v1671_v42 }
 0x114 LB: >> { %v2088_v44 = vmov 0.0   ;;  %vm2089_vm2 = vmmov 0   ;;  %s2373_s19 = sshll.u32 %s2086_s18, 4  ;;  %s2609_s14 = sld [smem:[#allocation21_spill]]  ;;  %vm1033_vm3 = vcmask 64512   ;;  %vm965_vm4 = vcmask 261120   ;;  %s2086_s18 = sphi %s2358_s18, %s935_s18   ;;  %v2082_v42 = vphi %v1671_v42, %v2611_v42   ;;  %v2078_v43 = vphi %v2608_v43, %v2610_v43  }
 0x115   : >> { %1771 = vmatprep.subr.bf16.mxu0 %v2088_v44  ;;  %1775 = vmatprep.mubr.msk.bf16.mxu0 %vm2089_vm2, %v2088_v44  ;;  %s1012_s16 = scalar_lea.vmem [#allocation2], %s2373_s19  ;;  %s1018_s17 = scalar_lea.vmem [#allocation3], %s2373_s19  ;;  %vm1170_vm5 = vcmask 1043456  }
 0x116   : >> { %1779 = vmatprep.subr.bf16.mxu1 %v2088_v44  ;;  %1783 = vmatprep.mubr.msk.bf16.mxu1 %vm2089_vm2, %v2088_v44  ;;  %s945_s21 = scalar_lea.vmem %s2549_s4, %s2086_s18  ;;  %s1686_s2 = sshll.u32 %s2086_s18, 2 }
 0x117   : >> { %v1936_v47 = vld [vmem:[%s1012_s16 + $0x8] sm:$0xff]   ;;  %v1937_v49 = vld [vmem:[%s1012_s16] sm:$0xff]   ;;  %s1165_s26 = scalar_lea.vmem %s2554_s9, %s1686_s2  ;;  %s935_s18 = sadd.s32 1, %s2086_s18  }
 0x118   : >> { %v1041_v48 = vsel %vm1033_vm3, %v1936_v47, 0  ;;  %v1038_v50 = vsel %vm1033_vm3, %v1937_v49, 0  ;;  %v1674_v52 = vld [vmem:[%s945_s21] ss:$0 sm:$0xff]  ;;  %v1938_v18 = vld [vmem:[%s1018_s17 + $0x8] sm:$0xff]   ;;  %p932_p2 = scmp.ge.s32.totalorder %s935_s18, 4  }
 0x119   : >> { %1780 = vmatpush3.bf16.xpose.msra.mxu1 %v1041_v48  ;;  %v1939_v19 = vld [vmem:[%s1018_s17] sm:$0xff]   ;;  %vm2091_vm6 = vmmov (%p932_p2), 0   ;;  %s2614_s17 = sld [smem:[#allocation23_spill]] (%p932_p2)  ;;  %vm1375_vm7 = vcmask (%p932_p2), 523264   ;;  %s1704_s18 = sshll.u32 (%p932_p2), %s2058_s1, 2 }
 0x11a   : >> { %s940_s15 = scalar_lea.vmem %s2609_s14, %s2373_s19  ;;  %1781 = vmatprep.subr.bf16.mxu1 %v2088_v44  ;;  %v1166_v24 = vld [vmem:[%s1165_s26] sm:$0xf]  ;;  %s2612_s19 = sld [smem:[#allocation25_spill]] (%p932_p2) }
 0x11b   : >> { %v1934_v45 = vld [vmem:[%s940_s15 + $0x8] sm:$0xff]   ;;  %v1935_v46 = vld [vmem:[%s940_s15] sm:$0xff]   ;;  %v1172_v28 = vsel %vm1170_vm5, %v1166_v24, 0  ;;  %s2613_s14 = sld [smem:[#allocation22_spill]] (%p932_p2)  ;;  %s1481_s30 = sadd.s32 (%p932_p2), %s1704_s18, %s2268_s22 }
 0x11c   : >> { %1772 = vmatpush3.bf16.msra.mxu0 %v1934_v45  ;;  %s2615_s29 = sld [smem:[#allocation24_spill]] (%p932_p2)  ;;  %s1705_s2 = sshll.u32 (%p932_p2), %s1481_s30, 7 }
 0x11d   : >> { %1773 = vmatprep.subr.bf16.mxu0 %v2088_v44  ;;  %s2616_s24 = sld [smem:[#allocation26_spill]] (%p932_p2)  ;;  %s1484_s1 = sshll.u32 (%p932_p2), %s2293_s20, 4  ;;  %s2488_s1 = int_to_ptr.vmem [resolvable:$true] %s1484_s1 }
 0x11e   : > { %s2618_s15 = sld [smem:[#allocation8_spill]] (%p932_p2)  ;;  %s1962_s25 = scalar_lea.vmem (%p932_p2), %s2488_s1, 256 }
 0x11f   : > { %s2619_s0 = sld [smem:[#allocation28_spill]] (%p932_p2)  ;;  %p1963_p4 = scmp.ne.s32.totalorder (%p932_p2), %s2488_s1, %s1962_s25 }
 0x120   : >> { %1774 = vmatpush3.bf16.msra.mxu0 %v1935_v46  ;;  %s2621_s26 = sld [smem:[#allocation29_spill]] (%p932_p2)  ;;  %s2092_s27 = smov (%p932_p2), [#allocation4]  }
 0x121   : >> { %1787 = vmatprep.subr.bf16.mxu0 %v2088_v44  ;;  %1782 = vmatpush3.bf16.xpose.msra.mxu1 %v1038_v50  ;;  %p1964_p5 = pnand (%p932_p2), %p1963_p4, %p2246_p3 }
 0x123   : >> { %1776 = vmatmul.mubr.msk.bf16.vlgmr.msra.gmra.mxu0 %vm965_vm4, %v922_v41  ;;  %v1950_v41 = vld [vmem:[%s2612_s19 + $0x18] sm:$0xff] (%p932_p2)   ;;  %v1694_v24 = vld [vmem:[%s2616_s24] ss:$0 sm:$0xff] (%p932_p2)  ;;  %p1965_p6 = pneg (%p932_p2), %p1964_p5  ;;  %s1966_s24 = sshll.u32 (%p932_p2), %s2092_s27, 4  ;;  %s1967_s24 = int_to_ptr.vmem [resolvable:$false] %s1966_s24 }
 0x124   : >> { %1791 = vmatprep.mubr.msk.bf16.mxu0 %vm2089_vm2, %v2088_v44  ;;  %1788 = vmatpush3.bf16.msra.mxu0 %v1938_v18  ;;  %s2622_s22 = sand.u32 (%p932_p2), 1, %s2618_s15   ;;  %s1968_s18 = scalar_lea.vmem (%p932_p2), %s1967_s24, 512 }
 0x125   : >> { %1789 = vmatprep.subr.bf16.mxu0 %v2088_v44  ;;  %p1969_p7 = scmp.lt.s32.totalorder (%p932_p2), %s2488_s1, %s1967_s24  ;;  %p1970_p9 = scmp.lt.s32.totalorder (%p932_p2), %s1968_s18, %s1962_s25 }
 0x126   : > { %s2486_s28 = scalar_lea.hbm (%p932_p2), %s2621_s26, %s1705_s2 }
 0x127   : > { %p1971_p10 = por (%p932_p2), %p1970_p9, %p1969_p7 }
 0x128   : >> { %1790 = vmatpush3.bf16.msra.mxu0 %v1939_v19 }
 0x129   : >> { %1795 = vmatprep.subr.bf16.mxu0 %v2088_v44  ;;  %p1972_p11 = pnand (%p932_p2), %p1971_p10, %p1965_p6 }
 0x1e3   : >> { %v1003_v51 = vpop.f32.mrf.mxu0 }
 0x1e4   : >> { %v1004_v55 = vadd.f32 %v1674_v52, %v1003_v51 }
 0x1e5   : >> { %v1777_v53 = vpop.f32.mrf.mxu0 }
 0x1e7   : >> { %v1006_v54 = vpop.f32.mrf.mxu0 }
 0x1e8   : >> { %v1007_v56 = vadd.f32 %v1674_v52, %v1006_v54 }
 0x1e9   : >> { %v1778_v57 = vpop.f32.mrf.mxu0 }
 0x1ea   : >> { %v1010_v58 = vpack.c.bf16 %v1007_v56, %v1004_v55 }
 0x1ec   : >> { %1784 = vmatmul.mubr.msk.bf16.vlgmr.msra.gmra.mxu1 %vm1033_vm3, %v1010_v58 }
 0x2ac   : >> { %v1077_v59 = vpop.f32.mrf.mxu1 }
 0x2ad   : >> { %v1078_v60 = vadd.f32 %v1726_v3, %v1077_v59  ;;  %v2090_v3 = vmov (%p932_p2), 0.0  }
 0x2ae   : >> { %v1785_v61 = vpop.f32.mrf.mxu1  ;;  %1809 = vmatprep.subr.bf16.mxu1 (%p932_p2), %v2090_v3  ;;  %1817 = vmatprep.mubr.msk.bf16.mxu1 (%p932_p2), %vm2091_vm6, %v2090_v3 }
 0x2af   : >> { %v1084_v62 = vsel %vm965_vm4, %v1078_v60, -inf  ;;  %1810 = vmatpush3.bf16.msra.mxu1 (%p932_p2), %v1950_v41  ;;  %v1688_v61 = vld [vmem:[%s2613_s14] ss:$0 sm:$0xff] (%p932_p2)  ;;  %s2617_s14 = sld [smem:[#allocation27_spill]] (%p932_p2) }
 0x2b0   : >> { %1085 = vmax.xlane.f32.xlu0 %v1084_v62  ;;  %v1080_v63 = vpop.f32.mrf.mxu1  ;;  %1811 = vmatprep.subr.bf16.mxu1 (%p932_p2), %v2090_v3 }
 0x2b1   : >> { %v1081_v5 = vadd.f32 %v1727_v4, %v1080_v63  ;;  %v1949_v4 = vld [vmem:[%s2558_s13] sm:$0xff] (%p932_p2)  }
 0x2b2   : >> { %v1786_v6 = vpop.f32.mrf.mxu1 }
 0x2b3   : >> { %v1087_v7 = vsel %vm965_vm4, %v1081_v5, -inf  ;;  %v1689_v6 = vld [vmem:[%s2614_s17] ss:$0 sm:$0xff] (%p932_p2) }
 0x2b4   : >> { %1088 = vmax.xlane.f32.xlu0 %v1087_v7 }
 0x339   : >> { %v1086_v8 = vpop.xlane.xlu0 %1085 }
 0x33a   : >> { %v1090_v9 = vsub.f32 %v1078_v60, %v1086_v8 }
 0x33c   : >> { %v1092_v10 = vmul.f32 1.442695, %v1090_v9 }
 0x33d   : >> { %v1089_v11 = vpop.xlane.xlu0 %1088 }
 0x33e   : >> { %1940 = vpow2.f32 %v1092_v10  ;;  %v1091_v12 = vsub.f32 %v1081_v5, %v1089_v11  ;;  %v1951_v11 = vld [vmem:[%s2612_s19 + $0x10] sm:$0xff] (%p932_p2)  }
 0x33f   : > { %1812 = vmatpush3.bf16.msra.mxu1 (%p932_p2), %v1951_v11 }
 0x340   : >> { %v1094_v13 = vmul.f32 1.442695, %v1091_v12  ;;  %1813 = vmatprep.subr.bf16.mxu1 (%p932_p2), %v2090_v3  ;;  %v1952_v12 = vld [vmem:[%s2612_s19 + $0x8] sm:$0xff] (%p932_p2)  }
 0x342   : >> { %1942 = vpow2.f32 %v1094_v13  ;;  %v1953_v13 = vld [vmem:[%s2612_s19] sm:$0xff] (%p932_p2)  }
 0x343   : > { %1814 = vmatpush3.bf16.msra.mxu1 (%p932_p2), %v1952_v12 }
 0x344   : > { %1815 = vmatprep.subr.bf16.mxu1 (%p932_p2), %v2090_v3 }
 0x347   : > { %1816 = vmatpush3.bf16.msra.mxu1 (%p932_p2), %v1953_v13 }
 0x34b   : >> { %v1941_v14 = vpop.eup %1940 }
 0x34c   : >> { %v1096_v15 = vsel %vm965_vm4, %v1941_v14, 0.0 }
 0x34d   : >> { %1097 = vadd.xlane.f32.xlu1 %v1096_v15 }
 0x34f   : >> { %v1943_v16 = vpop.eup %1942 }
 0x350   : >> { %v1099_v17 = vsel %vm965_vm4, %v1943_v16, 0.0 }
 0x351   : >> { %1100 = vadd.xlane.f32.xlu1 %v1099_v17 }
 0x3d6   : >> { %v1098_v20 = vpop.xlane.xlu1 %1097 }
 0x3d7   : >> { %1944 = vrcp.f32 %v1098_v20 }
 0x3da   : >> { %v1101_v21 = vpop.xlane.xlu1 %1100 }
 0x3db   : >> { %1946 = vrcp.f32 %v1101_v21 }
 0x3e4   : >> { %v1945_v22 = vpop.eup %1944 }
 0x3e5   : >> { %v1104_v26 = vmul.f32 %v1945_v22, %v1941_v14  ;;  %v1690_v14 = vld [vmem:[%s2615_s29] ss:$0 sm:$0xff] (%p932_p2)  ;;  %s2494_s29 = scalar_lea.sflag (%p932_p2), [#allocation5], %s2622_s22 }
 0x3e8   : >> { %v1947_v23 = vpop.eup %1946 }
 0x3e9   : >> { %v1105_v25 = vmul.f32 %v1947_v23, %v1943_v16 }
 0x3eb   : >> { %v1106_v27 = vpack.c.bf16 %v1105_v25, %v1104_v26 }
 0x3ed   : >> { %1792 = vmatmul.mubr.msk.bf16.vlgmr.msra.gmra.mxu0 %vm965_vm4, %v1106_v27 }
 0x3ee   : >> { %1796 = vmatpush3.bf16.msra.mxu0 %v1172_v28  ;;  %1797 = vmatprep.mubr.msk.bf16.mxu0 %vm2089_vm2, %v2088_v44 }
 0x3ef   : > { %1801 = vmatprep.subr.bf16.mxu0 (%p932_p2), %v2090_v3 }
 0x4ad   : >> { %v1156_v29 = vpop.f32.mrf.mxu0 }
 0x4af   : >> { %v1793_v30 = vpop.f32.mrf.mxu0 }
 0x4b1   : >> { %v1159_v31 = vpop.f32.mrf.mxu0 }
 0x4b2   : >> { %v1163_v32 = vpack.c.bf16 %v1159_v31, %v1156_v29 }
 0x4b3   : >> { %v1794_v33 = vpop.f32.mrf.mxu0 }
 0x4b4   : >> { %1798 = vmatmul.mubr.msk.bf16.vlgmr.msra.gmra.mxu0 %vm1033_vm3, %v1163_v32 }
 0x4b5   : > { %1805 = vmatprep.mubr.msk.bf16.mxu0 (%p932_p2), %vm2091_vm6, %v2090_v3 }
 0x574   : >> { %v1208_v34 = vpop.f32.mrf.mxu0 }
 0x575   : >> { %v1215_v35 = vadd.f32 %v2082_v42, %v1208_v34  }
 0x576   : >> { %v1799_v36 = vpop.f32.mrf.mxu0 }
 0x577   : >> { %v2611_v42 = vmov %v1215_v35  ;;  %934 = sbr.rel (!%p932_p2) target bundleno = 276 (0x114), region = 177  ;;  %v1217_v40 = vadd.f32 (%p932_p2), %v1215_v35, %v2285_v0 }
 0x578   : >> { %v1211_v37 = vpop.f32.mrf.mxu0 }
 0x579   : >> { %v1216_v38 = vadd.f32 %v2078_v43, %v1211_v37   ;;  %v1222_v42 = vsel (%p932_p2), %vm965_vm4, %v1217_v40, 0.0 }
 0x57a   : >> { %v1800_v39 = vpop.f32.mrf.mxu0  ;;  %1223 = vadd.xlane.f32.xlu0 (%p932_p2), %v1222_v42 }
 0x57b   : >> { %v2610_v43 = vmov %v1216_v38  ;;  %v1218_v44 = vadd.f32 (%p932_p2), %v1216_v38, %v2287_v1  ;;  %v1948_v1 = vld [vmem:[%s2558_s13 + $0x8] sm:$0xff] (%p932_p2)  }
 0x57c   : > { %1802 = vmatpush3.bf16.msra.mxu0 %v1948_v1  ;;  %v1701_v1 = vld [vmem:[%s2619_s0] ss:$0 sm:$0xff] }
 0x57d   : > { %v1225_v45 = vsel %vm965_vm4, %v1218_v44, 0.0  ;;  %1803 = vmatprep.subr.bf16.mxu0 %v2090_v3 }
 0x57e   : > { %1226 = vadd.xlane.f32.xlu0 %v1225_v45 }
 0x580   : > { %1804 = vmatpush3.bf16.msra.mxu0 %v1949_v4 }
 0x603   : > { %v1224_v46 = vpop.xlane.xlu0 %1223 }
 0x604   : > { %v1229_v47 = vmul.f32 0.03125, %v1224_v46 }
 0x606   : > { %v1231_v48 = vsub.f32 %v1217_v40, %v1229_v47 }
 0x607   : > { %v1227_v49 = vpop.xlane.xlu0 %1226 }
 0x608   : > { %v1230_v50 = vmul.f32 0.03125, %v1227_v49  ;;  %v1233_v51 = vmul.f32 %v1231_v48, %v1231_v48 }
 0x60a   : > { %v1232_v52 = vsub.f32 %v1218_v44, %v1230_v50  ;;  %v1235_v53 = vsel %vm965_vm4, %v1233_v51, 0.0 }
 0x60b   : > { %1236 = vadd.xlane.f32.xlu1 %v1235_v53 }
 0x60c   : > { %v1234_v2 = vmul.f32 %v1232_v52, %v1232_v52 }
 0x60e   : > { %v1238_v0 = vsel %vm965_vm4, %v1234_v2, 0.0  ;;  %v1700_v2 = vld [vmem:[%s2617_s14] ss:$0 sm:$0xff] }
 0x60f   : > { %1239 = vadd.xlane.f32.xlu1 %v1238_v0 }
 0x694   : > { %v1237_v43 = vpop.xlane.xlu1 %1236 }
 0x695   : > { %v1241_v54 = vmul.f32 0.03125, %v1237_v43 }
 0x697   : > { %v1243_v55 = vadd.f32 1e-12, %v1241_v54 }
 0x698   : > { %v1240_v56 = vpop.xlane.xlu1 %1239 }
 0x699   : > { %1954 = vrsqrt.f32 %v1243_v55  ;;  %v1242_v57 = vmul.f32 0.03125, %v1240_v56 }
 0x69b   : > { %v1244_v58 = vadd.f32 1e-12, %v1242_v57 }
 0x69d   : > { %1956 = vrsqrt.f32 %v1244_v58 }
 0x6a6   : > { %v1955_v59 = vpop.eup %1954 }
 0x6a7   : > { %v1247_v60 = vmul.f32 %v1955_v59, %v1231_v48 }
 0x6a9   : > { %v1255_v5 = vmul.f32 %v1688_v61, %v1247_v60 }
 0x6aa   : > { %v1957_v62 = vpop.eup %1956 }
 0x6ab   : > { %v1248_v63 = vmul.f32 %v1957_v62, %v1232_v52  ;;  %v1263_v8 = vadd.f32 %v1689_v6, %v1255_v5 }
 0x6ad   : > { %v1256_v7 = vmul.f32 %v1688_v61, %v1248_v63 }
 0x6af   : > { %v1264_v9 = vadd.f32 %v1689_v6, %v1256_v7 }
 0x6b1   : > { %v1265_v10 = vpack.c.bf16 %v1264_v9, %v1263_v8 }
 0x6b3   : > { %1806 = vmatmul.mubr.msk.bf16.vlgmr.msra.gmra.mxu0 %vm965_vm4, %v1265_v10 }
 0x773   : > { %v1326_v15 = vpop.f32.mrf.mxu0 }
 0x774   : > { %v1327_v17 = vadd.f32 %v1690_v14, %v1326_v15 }
 0x775   : > { %v1807_v16 = vpop.f32.mrf.mxu0 }
 0x776   : > { %v1333_v21 = vmax.f32 %v1327_v17, 0.0 }
 0x777   : > { %v1329_v18 = vpop.f32.mrf.mxu0 }
 0x778   : > { %v1330_v19 = vadd.f32 %v1690_v14, %v1329_v18 }
 0x779   : > { %v1808_v20 = vpop.f32.mrf.mxu0 }
 0x77a   : > { %v1334_v22 = vmax.f32 %v1330_v19, 0.0 }
 0x77c   : > { %v1335_v23 = vpack.c.bf16 %v1334_v22, %v1333_v21 }
 0x77e   : > { %1818 = vmatmul.mubr.msk.bf16.vlgmr.msra.gmra.mxu1 %vm1375_vm7, %v1335_v23 }
 0x83e   : > { %v1413_v25 = vpop.f32.mrf.mxu1 }
 0x83f   : > { %v1414_v26 = vadd.f32 %v1694_v24, %v1413_v25 }
 0x840   : > { %v1819_v27 = vpop.f32.mrf.mxu1 }
 0x841   : > { %v1420_v28 = vadd.f32 %v1414_v26, %v1263_v8 }
 0x842   : > { %v1416_v29 = vpop.f32.mrf.mxu1 }
 0x843   : > { %v1417_v30 = vadd.f32 %v1694_v24, %v1416_v29  ;;  %v1424_v31 = vsel %vm965_vm4, %v1420_v28, 0.0 }
 0x844   : > { %1425 = vadd.xlane.f32.xlu0 %v1424_v31  ;;  %v1820_v32 = vpop.f32.mrf.mxu1 }
 0x845   : > { %v1421_v33 = vadd.f32 %v1417_v30, %v1264_v9 }
 0x847   : > { %v1427_v34 = vsel %vm965_vm4, %v1421_v33, 0.0 }
 0x848   : > { %1428 = vadd.xlane.f32.xlu1 %v1427_v34 }
 0x8cd   : > { %v1426_v35 = vpop.xlane.xlu0 %1425 }
 0x8ce   : > { %v1430_v36 = vmul.f32 0.03125, %v1426_v35 }
 0x8d0   : > { %v1432_v37 = vsub.f32 %v1420_v28, %v1430_v36 }
 0x8d1   : > { %v1429_v38 = vpop.xlane.xlu1 %1428 }
 0x8d2   : > { %v1431_v39 = vmul.f32 0.03125, %v1429_v38  ;;  %v1434_v40 = vmul.f32 %v1432_v37, %v1432_v37 }
 0x8d4   : > { %v1433_v44 = vsub.f32 %v1421_v33, %v1431_v39  ;;  %v1436_v42 = vsel %vm965_vm4, %v1434_v40, 0.0 }
 0x8d5   : > { %1437 = vadd.xlane.f32.xlu0 %v1436_v42 }
 0x8d6   : > { %v1435_v45 = vmul.f32 %v1433_v44, %v1433_v44 }
 0x8d8   : > { %v1439_v46 = vsel %vm965_vm4, %v1435_v45, 0.0 }
 0x8d9   : > { %1440 = vadd.xlane.f32.xlu1 %v1439_v46 }
 0x95e   : > { %v1438_v47 = vpop.xlane.xlu0 %1437 }
 0x95f   : > { %v1442_v48 = vmul.f32 0.03125, %v1438_v47 }
 0x961   : > { %v1444_v49 = vadd.f32 1e-12, %v1442_v48 }
 0x962   : > { %v1441_v50 = vpop.xlane.xlu1 %1440 }
 0x963   : > { %1958 = vrsqrt.f32 %v1444_v49  ;;  %v1443_v51 = vmul.f32 0.03125, %v1441_v50 }
 0x965   : > { %v1445_v52 = vadd.f32 1e-12, %v1443_v51 }
 0x967   : > { %1960 = vrsqrt.f32 %v1445_v52 }
 0x970   : > { %v1959_v53 = vpop.eup %1958 }
 0x971   : > { %v1448_v0 = vmul.f32 %v1959_v53, %v1432_v37 }
 0x973   : > { %v1456_v3 = vmul.f32 %v1700_v2, %v1448_v0 }
 0x974   : > { %v1961_v4 = vpop.eup %1960 }
 0x975   : > { %v1449_v41 = vmul.f32 %v1961_v4, %v1433_v44  ;;  %v1464_v43 = vadd.f32 %v1701_v1, %v1456_v3 }
 0x977   : > { %v1457_v54 = vmul.f32 %v1700_v2, %v1449_v41  ;;  %1466 = vst.msk [vmem:[%s2293_s20] sm:$0xff] %vm965_vm4, %v1464_v43 }
 0x979   : > { %v1465_v55 = vadd.f32 %v1701_v1, %v1457_v54 }
 0x97b   : > { %1467 = vst.msk [vmem:[%s2293_s20 + $0x8] sm:$0xff] %vm965_vm4, %v1465_v55 }
 0x97c   : > { %1975 = shalt.err (!%p1972_p11)
}
 0x97d   : > { %s1976_s20 = scalar_lea.hbm %s2486_s28, 256  ;;  %s1980_s14 = scalar_lea.hbm %s2621_s26, 1024 }
 0x97e   : > { %p1977_p12 = scmp.ne.s32.totalorder %s2486_s28, %s1976_s20  ;;  %p1981_p1 = scmp.lt.s32.totalorder %s2486_s28, %s2621_s26 }
 0x97f   : > { %p1982_p2 = scmp.lt.s32.totalorder %s1980_s14, %s1976_s20 }
 0x980   : > { %p1978_p13 = pnand %p1977_p12, %p2246_p3 }
 0x981   : > { %p1983_p4 = por %p1982_p2, %p1981_p1 }
 0x982   : > { %p1979_p0 = pneg %p1978_p13 }
 0x984   : > { %p1984_p5 = pnand %p1983_p4, %p1979_p0 }
 0x986   : > { %1987 = shalt.err (!%p1984_p5)
}
 0x987   : > { %s2093_s17 = smov 128   ;;  %s2094_s0 = smov 8  }
 0x988   : > { %1821 = dma.vmem_to_hbm [thread:$0]  (%p2246_p3), %s2488_s1, 256, %s2486_s28, %s2494_s29, %s2093_s17, %s2093_s17, %s2094_s0  }
 0x989 PF: > { %s2623_s30 = sld [smem:[#allocation12_spill]] }
 0x98a   : > { %s2624_s2 = sld [smem:[#allocation7_spill]] }
 0x98f   : > { %p1827_p6 = scmp.ge.s32.totalorder %s2623_s30, 2 }
 0x990   : > { %s1499_s3 = sand.u32 1, %s2624_s2  }
 0x991   : > { %p1824_p7 = pnand %p1827_p6, %p2255_p8  ;;  %s1500_s22 = scalar_lea.sflag [#allocation5], %s1499_s3 }
 0x993   : > { %p1825_p9 = pneg %p1824_p7 }
 0x995   : > { %2037 = dma.done.wait (%p1825_p9), %s1500_s22, 256  }
 0x996   : > { %2039 = vsyncadd (%p1825_p9), %s1500_s22, 4294967040  ;;  %s32_s23 = sadd.s32 1, %s2623_s30   ;;  %s2626_s0 = sld [smem:[#allocation8_spill]] }
 0x997   : > { %p29_p10 = scmp.ge.s32.totalorder %s32_s23, 6   ;;  %s2627_s30 = sld [smem:[#allocation9_spill]] }
 0x998   : > { %s2628_s20 = sld [smem:[#allocation17_spill]] }
 0x999   : > { %s2629_s21 = sld [smem:[#allocation10_spill]]  ;;  %31 = sbr.rel (!%p29_p10) target bundleno = 18 (0x12), region = 188 }
 0x99a   : > { %s2630_s1 = sld [smem:[#allocation11_spill]] }
 0x99b   : > { %s2631_s22 = sld [smem:[#allocation13_spill]] }
 0x99c   : > { %s2632_s2 = sld [smem:[#allocation15_spill]] }
 0x99e   :  { %1505 = vsyncpa [#allocation5], 1 }
 0x99f   :  { %1507 = vsyncpa [#allocation5 + $0x1], 1 }

</bundles_post_ra>
